<compile_context>
chip_gen: v5e
topology: v5e:2x2
jax: 0.10.0
libtpu: 0.0.40
codegen_flags: <defaults>
</compile_context>

<pallas_src>
import functools
import math

import jax
import jax.numpy as jnp
import numpy as np
from jax import lax
from jax.experimental import pallas as pl
from jax.experimental.pallas import tpu as pltpu


_SQRT_HALF = 1.0 / math.sqrt(2.0)
_BF16 = jnp.bfloat16

# Softmax denominator: EUP approximate reciprocal (free slot).  Set to False
# for exact parity with an f32 softmax division.
_APPROX_RECIPROCAL = True

# VMEM planning: tiles are chosen so the (double-buffered) footprint estimate
# stays under _VMEM_BUDGET; the explicit limit is safe on every generation
# (v5e/v6e: 128 MiB physical, v7x: 64 MiB physical).
_VMEM_BUDGET = 30 * 1024 * 1024
_VMEM_LIMIT = 48 * 1024 * 1024

_M_TILE_CANDS = (512, 256, 128, 64, 32, 16, 8)
_N_TILE_CANDS = (512, 256, 128)
_K_TILE_CANDS = (1024, 512, 256, 128)
_S_TILE_CANDS = (256, 128, 64, 32, 16, 8)


def _itemsize(dt):
    return np.dtype(dt).itemsize


def _divisor(n, cands):
    """Largest aligned candidate dividing n, else the full dimension."""
    for c in cands:
        if c <= n and n % c == 0:
            return c
    return n   # TODO(synk): pad + mask instead of a full-dim block for awkward sizes.


def _mosaic(dims):
    return pltpu.CompilerParams(dimension_semantics=dims,
                                vmem_limit_bytes=_VMEM_LIMIT)


# ----------------------------- linear kernels -----------------------------

def _linear_resident_kernel(x_ref, w_ref, b_ref, o_ref, *, activation):
    """o = x @ w + b (optional fused gelu); full-K, full-N weight in VMEM."""
    y = jnp.dot(x_ref[...], w_ref[...], preferred_element_type=jnp.float32)
    y = y + b_ref[...].astype(jnp.float32)
    if activation == "gelu":              # exact erf gelu (HF BERT)
        y = 0.5 * y * (1.0 + lax.erf(y * _SQRT_HALF))
    o_ref[...] = y.astype(o_ref.dtype)


def _matmul_bias_kernel(x_ref, w_ref, b_ref, o_ref, acc_ref, *, activation):
    """Fallback: (M,N,K)-tiled o = x @ w + b, K-reduction on grid axis 2."""
    @pl.when(pl.program_id(2) == 0)
    def _init():
        acc_ref[...] = jnp.zeros_like(acc_ref)

    acc_ref[...] += jnp.dot(x_ref[...], w_ref[...],
                            preferred_element_type=jnp.float32)

    @pl.when(pl.program_id(2) == pl.num_programs(2) - 1)
    def _finish():
        y = acc_ref[...] + b_ref[...].astype(jnp.float32)
        if activation == "gelu":
            y = 0.5 * y * (1.0 + lax.erf(y * _SQRT_HALF))
        o_ref[...] = y.astype(o_ref.dtype)


def linear(x2d, w, b, activation=None, out_dtype=None):
    """o = x2d @ w + b (optional fused gelu).  x2d: [M, K] bf16, w: [K, N] bf16."""
    M, K = x2d.shape
    N = w.shape[1]
    if out_dtype is None:
        out_dtype = x2d.dtype
    xb, wb, ob = _itemsize(x2d.dtype), _itemsize(w.dtype), _itemsize(out_dtype)

    # Preferred path: weight fully VMEM-resident, grid over M only.
    tm_res = None
    for tm in ([c for c in _M_TILE_CANDS if M % c == 0] or [M]):
        est = 2 * (tm * K * xb + K * N * wb + tm * N * ob + N * 4)
        if est <= _VMEM_BUDGET:
            tm_res = tm
            break

    if tm_res is not None:
        tm = tm_res
        return pl.pallas_call(
            functools.partial(_linear_resident_kernel, activation=activation),
            out_shape=jax.ShapeDtypeStruct((M, N), out_dtype),
            grid=(M // tm,),
            in_specs=[pl.BlockSpec((tm, K), lambda i: (i, 0)),
                      pl.BlockSpec((K, N), lambda i: (0, 0)),
                      pl.BlockSpec((1, N), lambda i: (0, 0))],
            out_specs=pl.BlockSpec((tm, N), lambda i: (i, 0)),
            compiler_params=_mosaic(("parallel",)),
        )(x2d, w, b.reshape(1, N))

    # Fallback: (M, N, K) tiled with an f32 accumulator.
    tm = _divisor(M, _M_TILE_CANDS)
    tn = _divisor(N, _N_TILE_CANDS)
    tk = _divisor(K, _K_TILE_CANDS)
    return pl.pallas_call(
        functools.partial(_matmul_bias_kernel, activation=activation),
        out_shape=jax.ShapeDtypeStruct((M, N), out_dtype),
        grid=(M // tm, N // tn, K // tk),
        in_specs=[pl.BlockSpec((tm, tk), lambda i, j, k: (i, k)),
                  pl.BlockSpec((tk, tn), lambda i, j, k: (k, j)),
                  pl.BlockSpec((1, tn), lambda i, j, k: (0, j))],
        out_specs=pl.BlockSpec((tm, tn), lambda i, j, k: (i, j)),
        scratch_shapes=[pltpu.VMEM((tm, tn), jnp.float32)],
        compiler_params=_mosaic(("parallel", "parallel", "arbitrary")),
    )(x2d, w, b.reshape(1, N))


def _linear_res_ln_resident_kernel(x_ref, w_ref, b_ref, r_ref, g_ref, bt_ref,
                                   o_ref, *, eps):
    """o = LayerNorm(x @ w + b + residual); weight VMEM-resident."""
    h = jnp.dot(x_ref[...], w_ref[...], preferred_element_type=jnp.float32)
    h = h + b_ref[...].astype(jnp.float32) + r_ref[...].astype(jnp.float32)
    mu = jnp.mean(h, axis=-1, keepdims=True)
    var = jnp.mean(jnp.square(h - mu), axis=-1, keepdims=True)
    o_ref[...] = ((h - mu) * lax.rsqrt(var + eps) * g_ref[...]
                  + bt_ref[...]).astype(o_ref.dtype)


def _matmul_res_ln_kernel(x_ref, w_ref, b_ref, r_ref, g_ref, bt_ref, o_ref,
                          acc_ref, *, eps):
    """Fallback: K-tiled matmul with LN fused into the last-K epilogue."""
    @pl.when(pl.program_id(1) == 0)
    def _init():
        acc_ref[...] = jnp.zeros_like(acc_ref)

    acc_ref[...] += jnp.dot(x_ref[...], w_ref[...],
                            preferred_element_type=jnp.float32)

    @pl.when(pl.program_id(1) == pl.num_programs(1) - 1)
    def _finish():
        h = (acc_ref[...] + b_ref[...].astype(jnp.float32)
             + r_ref[...].astype(jnp.float32))
        mu = jnp.mean(h, axis=-1, keepdims=True)
        var = jnp.mean(jnp.square(h - mu), axis=-1, keepdims=True)
        o_ref[...] = ((h - mu) * lax.rsqrt(var + eps) * g_ref[...]
                      + bt_ref[...]).astype(o_ref.dtype)


def linear_residual_layernorm(x2d, w, b, res2d, gamma, beta, eps):
    """Fused dense + residual-add + LayerNorm.  Full N per block (LN axis)."""
    M, K = x2d.shape
    N = w.shape[1]
    out_dtype = res2d.dtype                      # residual stream dtype (f32)
    xb, wb = _itemsize(x2d.dtype), _itemsize(w.dtype)
    rb, ob = _itemsize(res2d.dtype), _itemsize(out_dtype)

    args = (x2d, w, b.reshape(1, N), res2d,
            gamma.reshape(1, N), beta.reshape(1, N))

    tm_res = None
    for tm in ([c for c in _M_TILE_CANDS if M % c == 0] or [M]):
        est = 2 * (tm * K * xb + K * N * wb + tm * N * (rb + ob) + 3 * N * 4)
        if est <= _VMEM_BUDGET:
            tm_res = tm
            break

    if tm_res is not None:
        tm = tm_res
        return pl.pallas_call(
            functools.partial(_linear_res_ln_resident_kernel, eps=eps),
            out_shape=jax.ShapeDtypeStruct((M, N), out_dtype),
            grid=(M // tm,),
            in_specs=[pl.BlockSpec((tm, K), lambda i: (i, 0)),
                      pl.BlockSpec((K, N), lambda i: (0, 0)),
                      pl.BlockSpec((1, N), lambda i: (0, 0)),
                      pl.BlockSpec((tm, N), lambda i: (i, 0)),
                      pl.BlockSpec((1, N), lambda i: (0, 0)),
                      pl.BlockSpec((1, N), lambda i: (0, 0))],
            out_specs=pl.BlockSpec((tm, N), lambda i: (i, 0)),
            compiler_params=_mosaic(("parallel",)),
        )(*args)

    # Fallback: K-tiled with f32 accumulator (LN still fused in the epilogue).
    tm = _divisor(M, _M_TILE_CANDS)
    tk = _divisor(K, _K_TILE_CANDS)
    return pl.pallas_call(
        functools.partial(_matmul_res_ln_kernel, eps=eps),
        out_shape=jax.ShapeDtypeStruct((M, N), out_dtype),
        grid=(M // tm, K // tk),
        in_specs=[pl.BlockSpec((tm, tk), lambda i, k: (i, k)),
                  pl.BlockSpec((tk, N), lambda i, k: (k, 0)),
                  pl.BlockSpec((1, N), lambda i, k: (0, 0)),
                  pl.BlockSpec((tm, N), lambda i, k: (i, 0)),
                  pl.BlockSpec((1, N), lambda i, k: (0, 0)),
                  pl.BlockSpec((1, N), lambda i, k: (0, 0))],
        out_specs=pl.BlockSpec((tm, N), lambda i, k: (i, 0)),
        scratch_shapes=[pltpu.VMEM((tm, N), jnp.float32)],
        compiler_params=_mosaic(("parallel", "arbitrary")),
    )(*args)


# --------------------------- attention kernel -----------------------------

def _flash_attn_kernel(q_ref, k_ref, v_ref, amask_ref, o_ref,
                       m_sc, l_sc, acc_sc, *, scale):
    """Flash-style online-softmax attention for one (batch, head-group, q-block)."""
    kv_idx = pl.program_id(3)

    @pl.when(kv_idx == 0)
    def _init():
        m_sc[...] = jnp.full(m_sc.shape, -jnp.inf, jnp.float32)
        l_sc[...] = jnp.zeros(l_sc.shape, jnp.float32)
        acc_sc[...] = jnp.zeros(acc_sc.shape, jnp.float32)

    # Pre-scale q (O(tq*d)) instead of scaling the (tq,tkv) score matrix.
    q = q_ref[0] * scale                    # (hg, tq, d)  bf16
    k = k_ref[0]                            # (hg, tkv, d) bf16
    v = v_ref[0]                            # (hg, tkv, d) bf16

    # Heads batched in one dot_general -> back-to-back MXU pushes.
    s = lax.dot_general(q, k, (((2,), (2,)), ((0,), (0,))),
                        preferred_element_type=jnp.float32)   # (hg, tq, tkv)
    s = s + amask_ref[0].astype(jnp.float32)   # additive HF mask over kv axis

    m_prev = m_sc[...]
    m_new = jnp.maximum(m_prev, jnp.max(s, axis=-1, keepdims=True))
    alpha = jnp.exp(m_prev - m_new)
    p = jnp.exp(s - m_new)
    l_sc[...] = alpha * l_sc[...] + jnp.sum(p, axis=-1, keepdims=True)
    pv = lax.dot_general(p.astype(v.dtype), v, (((2,), (1,)), ((0,), (0,))),
                         preferred_element_type=jnp.float32)  # (hg, tq, d)
    acc_sc[...] = alpha * acc_sc[...] + pv
    m_sc[...] = m_new

    @pl.when(kv_idx == pl.num_programs(3) - 1)
    def _finish():
        if _APPROX_RECIPROCAL:
            inv = pl.reciprocal(l_sc[...], approx=True)
        else:
            inv = 1.0 / l_sc[...]
        o_ref[0] = (acc_sc[...] * inv).astype(o_ref.dtype)


def attention(q, k, v, mask):
    """q, k, v: [B, nh, S, d] (bf16); mask: [B, 1, S] additive f32."""
    B, nh, S, d = q.shape
    scale = 1.0 / math.sqrt(d)
    tq = _divisor(S, _S_TILE_CANDS)
    tkv = _divisor(S, _S_TILE_CANDS)
    # Head-group size: batch enough heads per dot_general to feed the MXU.
    hg = 1
    for c in range(min(max(1, 256 // d), nh), 0, -1):
        if nh % c == 0:
            hg = c
            break
    grid = (B, nh // hg, S // tq, S // tkv)
    return pl.pallas_call(
        functools.partial(_flash_attn_kernel, scale=scale),
        out_shape=jax.ShapeDtypeStruct((B, nh, S, d), q.dtype),
        grid=grid,
        in_specs=[pl.BlockSpec((1, hg, tq, d), lambda b, h, qi, ki: (b, h, qi, 0)),
                  pl.BlockSpec((1, hg, tkv, d), lambda b, h, qi, ki: (b, h, ki, 0)),
                  pl.BlockSpec((1, hg, tkv, d), lambda b, h, qi, ki: (b, h, ki, 0)),
                  pl.BlockSpec((1, 1, tkv), lambda b, h, qi, ki: (b, 0, ki))],
        out_specs=pl.BlockSpec((1, hg, tq, d), lambda b, h, qi, ki: (b, h, qi, 0)),
        scratch_shapes=[pltpu.VMEM((hg, tq, 1), jnp.float32),
                        pltpu.VMEM((hg, tq, 1), jnp.float32),
                        pltpu.VMEM((hg, tq, d), jnp.float32)],
        compiler_params=_mosaic(("parallel", "parallel", "parallel", "arbitrary")),
    )(q, k, v, mask)


# ------------------------------ BERT wrapper ------------------------------

def bert_layer_forward(hidden, p, attention_mask, num_heads, eps):
    B, S, H = hidden.shape
    M = B * S
    d = H // num_heads
    x2d = hidden.reshape(M, H)                   # f32 residual stream
    x_bf = x2d.astype(_BF16)

    # Fused Q|K|V projection: one matmul with [H, 3H] bf16 weights.
    qkv = linear(x_bf, p["qkv_w"].astype(_BF16), p["qkv_b"],
                 out_dtype=_BF16)                # [M, 3H] bf16
    qkv = qkv.reshape(B, S, 3, num_heads, d)
    q = jnp.transpose(qkv[:, :, 0], (0, 2, 1, 3))    # [B, nh, S, d]
    k = jnp.transpose(qkv[:, :, 1], (0, 2, 1, 3))
    v = jnp.transpose(qkv[:, :, 2], (0, 2, 1, 3))

    if attention_mask is None:
        mask = jnp.zeros((B, 1, S), jnp.float32)
    else:  # HF additive mask [B, 1, 1, S] (or [B, S]) broadcast over heads & q.
        mask = attention_mask.reshape(B, 1, S).astype(jnp.float32)

    ctx = attention(q, k, v, mask)                       # [B, nh, S, d] bf16
    ctx2d = jnp.transpose(ctx, (0, 2, 1, 3)).reshape(M, H)

    # BertSelfOutput: dense fused with residual + LayerNorm epilogue (f32 out).
    attn_out = linear_residual_layernorm(
        ctx2d, p["ao_w"].astype(_BF16), p["ao_b"], x2d,
        p["ln1_g"], p["ln1_b"], eps)

    # BertIntermediate: dense + gelu fused (bf16 out, feeds the next matmul).
    inter = linear(attn_out.astype(_BF16), p["i_w"].astype(_BF16), p["i_b"],
                   activation="gelu", out_dtype=_BF16)

    # BertOutput: dense fused with residual + LayerNorm epilogue (f32 out).
    layer_out = linear_residual_layernorm(
        inter, p["o_w"].astype(_BF16), p["o_b"], attn_out,
        p["ln2_g"], p["ln2_b"], eps)
    return layer_out.reshape(B, S, H)


def bert_encoder_forward(hidden_states, params, attention_mask=None,
                         num_heads=4, eps=1e-12):
    for p in params:  # sequential stack of BertLayer
        hidden_states = bert_layer_forward(hidden_states, p, attention_mask,
                                           num_heads, eps)
    return (hidden_states,)


def init_params(key, num_layers, hidden, intermediate):
    params = []
    for _ in range(num_layers):
        keys = jax.random.split(key, 7)
        key = keys[0]

        def w(k, din, dout):
            return jax.random.normal(k, (din, dout), jnp.float32) * 0.02

        q_w = w(keys[1], hidden, hidden)
        k_w = w(keys[2], hidden, hidden)
        v_w = w(keys[3], hidden, hidden)
        p = {
            # fused Q|K|V projection (query/key/value concatenated on out dim)
            "qkv_w": jnp.concatenate([q_w, k_w, v_w], axis=1),
            "qkv_b": jnp.zeros((3 * hidden,), jnp.float32),
            "ao_w": w(keys[4], hidden, hidden),
            "ao_b": jnp.zeros((hidden,), jnp.float32),
            "ln1_g": jnp.ones((hidden,), jnp.float32),
            "ln1_b": jnp.zeros((hidden,), jnp.float32),
            "i_w": w(keys[5], hidden, intermediate),
            "i_b": jnp.zeros((intermediate,), jnp.float32),
            "o_w": w(keys[6], intermediate, hidden),
            "o_b": jnp.zeros((hidden,), jnp.float32),
            "ln2_g": jnp.ones((hidden,), jnp.float32),
            "ln2_b": jnp.zeros((hidden,), jnp.float32),
        }
        params.append(p)
    return params


# --------------------------- pure-JAX reference ----------------------------

def _ln_ref(x, g, b, eps):
    mu = jnp.mean(x, axis=-1, keepdims=True)
    var = jnp.mean(jnp.square(x - mu), axis=-1, keepdims=True)
    return (x - mu) * lax.rsqrt(var + eps) * g + b


def _reference_encoder(hidden, params, attention_mask, num_heads, eps):
    B, S, H = hidden.shape
    d = H // num_heads
    x = hidden
    for p in params:
        x2d = x.reshape(B * S, H)
        qkv = x2d @ p["qkv_w"] + p["qkv_b"]
        qkv = qkv.reshape(B, S, 3, num_heads, d)
        q = jnp.transpose(qkv[:, :, 0], (0, 2, 1, 3))
        k = jnp.transpose(qkv[:, :, 1], (0, 2, 1, 3))
        v = jnp.transpose(qkv[:, :, 2], (0, 2, 1, 3))
        s = jnp.einsum("bhqd,bhkd->bhqk", q, k) / math.sqrt(d)
        if attention_mask is not None:
            s = s + attention_mask.reshape(B, 1, 1, S)
        pr = jax.nn.softmax(s, axis=-1)
        ctx = jnp.einsum("bhqk,bhkd->bhqd", pr, v)
        ctx = jnp.transpose(ctx, (0, 2, 1, 3)).reshape(B * S, H)
        ao = _ln_ref(ctx @ p["ao_w"] + p["ao_b"] + x2d,
                     p["ln1_g"], p["ln1_b"], eps)
        inter = ao @ p["i_w"] + p["i_b"]
        inter = 0.5 * inter * (1.0 + lax.erf(inter * _SQRT_HALF))
        out = _ln_ref(inter @ p["o_w"] + p["o_b"] + ao,
                      p["ln2_g"], p["ln2_b"], eps)
        x = out.reshape(B, S, H)
    return x


if __name__ == "__main__":
    # config: hidden_size=32, num_attention_heads=4, intermediate_size=64,
    #         num_hidden_layers=2, layer_norm_eps=1e-12, hidden_act='gelu'
    B, S, H = 2, 8, 32
    NUM_HEADS, INTER, NUM_LAYERS = 4, 64, 2
    EPS = 1e-12

    key = jax.random.PRNGKey(0)
    k_x, k_p = jax.random.split(key)
    hidden_states = jax.random.normal(k_x, (B, S, H), jnp.float32)
    params = init_params(k_p, NUM_LAYERS, H, INTER)

    # One jit around the whole encoder so all pallas_calls live in one program.
    encoder = jax.jit(functools.partial(bert_encoder_forward,
                                        num_heads=NUM_HEADS, eps=EPS))
    outputs = encoder(hidden_states, params, None)
    out = jax.block_until_ready(outputs[0])
    assert out.shape == (B, S, H) and out.dtype == jnp.float32

    # Pure-JAX f32 reference; generous tolerance (matmul inputs are bf16).
    ref = _reference_encoder(hidden_states, params, None, NUM_HEADS, EPS)
    max_err = float(jnp.max(jnp.abs(out - ref)))
    assert max_err < 1e-1, f"max abs error vs reference too large: {max_err}"
    print("KERNEL_OK")
</pallas_src>

<mosaic_0001>
module attributes {stable_mosaic.version = 11 : i64} {
  func.func @_linear_resident_kernel(%arg0: i32, %arg1: memref<16x32xbf16, #tpu.memory_space<vmem>>, %arg2: memref<32x96xbf16, #tpu.memory_space<vmem>>, %arg3: memref<1x96xf32, #tpu.memory_space<vmem>>, %arg4: memref<16x96xbf16, #tpu.memory_space<vmem>>) attributes {dimension_semantics = [#tpu.dimension_semantics<parallel>], iteration_bounds = array<i64: 1>, scalar_prefetch = 0 : i64, scratch_operands = 0 : i64, tpu.core_type = #tpu.core_type<tc>, window_params = [{transform_indices = @transform_0, window_bounds = array<i64: 16, 32>}, {pipeline_mode = #tpu.pipeline_mode<synchronous>, transform_indices = @transform_1, window_bounds = array<i64: 32, 96>}, {pipeline_mode = #tpu.pipeline_mode<synchronous>, transform_indices = @transform_2, window_bounds = array<i64: 1, 96>}, {transform_indices = @transform_3, window_bounds = array<i64: 16, 96>}]} {
    %c0 = arith.constant 0 : index
    %c0_0 = arith.constant 0 : index
    %0 = vector.load %arg1[%c0, %c0_0] : memref<16x32xbf16, #tpu.memory_space<vmem>>, vector<16x32xbf16>
    %c0_1 = arith.constant 0 : index
    %c0_2 = arith.constant 0 : index
    %1 = vector.load %arg2[%c0_1, %c0_2] : memref<32x96xbf16, #tpu.memory_space<vmem>>, vector<32x96xbf16>
    %cst = arith.constant dense<0.000000e+00> : vector<16x96xf32>
    %2 = tpu.matmul %0, %1, %cst {dimension_numbers = #tpu.dot_dimension_numbers<[1], [0], [0], [1], [0, 0, 1, 1], [], []>} : vector<16x32xbf16>, vector<32x96xbf16>, vector<16x96xf32> -> vector<16x96xf32>
    %c0_3 = arith.constant 0 : index
    %c0_4 = arith.constant 0 : index
    %3 = vector.load %arg3[%c0_3, %c0_4] : memref<1x96xf32, #tpu.memory_space<vmem>>, vector<1x96xf32>
    %4 = vector.broadcast %3 : vector<1x96xf32> to vector<16x96xf32>
    %5 = arith.addf %2, %4 : vector<16x96xf32>
    %6 = arith.truncf %5 : vector<16x96xf32> to vector<16x96xbf16>
    %c0_5 = arith.constant 0 : index
    %c0_6 = arith.constant 0 : index
    %7 = vector.load %arg4[%c0_5, %c0_6] : memref<16x96xbf16, #tpu.memory_space<vmem>>, vector<16x96xbf16>
    tpu.vector_store %arg4[%c0_5, %c0_6], %6 {strides = array<i32>} : memref<16x96xbf16, #tpu.memory_space<vmem>>, vector<16x96xbf16>,
    return
  }
  func.func @transform_0(%arg0: i32) -> (i32, i32) {
    %c0_i32 = arith.constant 0 : i32
    %c0_i32_0 = arith.constant 0 : i32
    return %arg0, %c0_i32 : i32, i32
  }
  func.func @transform_1(%arg0: i32) -> (i32, i32) {
    %c0_i32 = arith.constant 0 : i32
    %c0_i32_0 = arith.constant 0 : i32
    %c0_i32_1 = arith.constant 0 : i32
    return %c0_i32, %c0_i32_0 : i32, i32
  }
  func.func @transform_2(%arg0: i32) -> (i32, i32) {
    %c0_i32 = arith.constant 0 : i32
    %c0_i32_0 = arith.constant 0 : i32
    %c0_i32_1 = arith.constant 0 : i32
    return %c0_i32, %c0_i32_0 : i32, i32
  }
  func.func @transform_3(%arg0: i32) -> (i32, i32) {
    %c0_i32 = arith.constant 0 : i32
    %c0_i32_0 = arith.constant 0 : i32
    return %arg0, %c0_i32 : i32, i32
  }
}

module attributes {stable_mosaic.version = 11 : i64} {
  func.func @_linear_res_ln_resident_kernel(%arg0: i32, %arg1: memref<16x32xbf16, #tpu.memory_space<vmem>>, %arg2: memref<32x32xbf16, #tpu.memory_space<vmem>>, %arg3: memref<1x32xf32, #tpu.memory_space<vmem>>, %arg4: memref<16x32xf32, #tpu.memory_space<vmem>>, %arg5: memref<1x32xf32, #tpu.memory_space<vmem>>, %arg6: memref<1x32xf32, #tpu.memory_space<vmem>>, %arg7: memref<16x32xf32, #tpu.memory_space<vmem>>) attributes {dimension_semantics = [#tpu.dimension_semantics<parallel>], iteration_bounds = array<i64: 1>, scalar_prefetch = 0 : i64, scratch_operands = 0 : i64, tpu.core_type = #tpu.core_type<tc>, window_params = [{transform_indices = @transform_0, window_bounds = array<i64: 16, 32>}, {pipeline_mode = #tpu.pipeline_mode<synchronous>, transform_indices = @transform_1, window_bounds = array<i64: 32, 32>}, {pipeline_mode = #tpu.pipeline_mode<synchronous>, transform_indices = @transform_2, window_bounds = array<i64: 1, 32>}, {transform_indices = @transform_3, window_bounds = array<i64: 16, 32>}, {pipeline_mode = #tpu.pipeline_mode<synchronous>, transform_indices = @transform_4, window_bounds = array<i64: 1, 32>}, {pipeline_mode = #tpu.pipeline_mode<synchronous>, transform_indices = @transform_5, window_bounds = array<i64: 1, 32>}, {transform_indices = @transform_6, window_bounds = array<i64: 16, 32>}]} {
    %c0 = arith.constant 0 : index
    %c0_0 = arith.constant 0 : index
    %0 = vector.load %arg1[%c0, %c0_0] : memref<16x32xbf16, #tpu.memory_space<vmem>>, vector<16x32xbf16>
    %c0_1 = arith.constant 0 : index
    %c0_2 = arith.constant 0 : index
    %1 = vector.load %arg2[%c0_1, %c0_2] : memref<32x32xbf16, #tpu.memory_space<vmem>>, vector<32x32xbf16>
    %cst = arith.constant dense<0.000000e+00> : vector<16x32xf32>
    %2 = tpu.matmul %0, %1, %cst {dimension_numbers = #tpu.dot_dimension_numbers<[1], [0], [0], [1], [0, 0, 1, 1], [], []>} : vector<16x32xbf16>, vector<32x32xbf16>, vector<16x32xf32> -> vector<16x32xf32>
    %c0_3 = arith.constant 0 : index
    %c0_4 = arith.constant 0 : index
    %3 = vector.load %arg3[%c0_3, %c0_4] : memref<1x32xf32, #tpu.memory_space<vmem>>, vector<1x32xf32>
    %4 = vector.broadcast %3 : vector<1x32xf32> to vector<16x32xf32>
    %5 = arith.addf %2, %4 : vector<16x32xf32>
    %c0_5 = arith.constant 0 : index
    %c0_6 = arith.constant 0 : index
    %6 = vector.load %arg4[%c0_5, %c0_6] : memref<16x32xf32, #tpu.memory_space<vmem>>, vector<16x32xf32>
    %7 = arith.addf %5, %6 : vector<16x32xf32>
    %cst_7 = arith.constant dense<0.000000e+00> : vector<16xf32>
    %8 = vector.multi_reduction <add>, %7, %cst_7 [1] : vector<16x32xf32> to vector<16xf32>
    %9 = vector.shape_cast %8 : vector<16xf32> to vector<16x1xf32>
    %cst_8 = arith.constant 3.200000e+01 : f32
    %10 = vector.broadcast %cst_8 : f32 to vector<16x1xf32>
    %11 = arith.divf %9, %10 : vector<16x1xf32>
    %12 = vector.broadcast %11 : vector<16x1xf32> to vector<16x32xf32>
    %13 = arith.subf %7, %12 : vector<16x32xf32>
    %14 = arith.mulf %13, %13 : vector<16x32xf32>
    %cst_9 = arith.constant dense<0.000000e+00> : vector<16xf32>
    %15 = vector.multi_reduction <add>, %14, %cst_9 [1] : vector<16x32xf32> to vector<16xf32>
    %16 = vector.shape_cast %15 : vector<16xf32> to vector<16x1xf32>
    %cst_10 = arith.constant 3.200000e+01 : f32
    %17 = vector.broadcast %cst_10 : f32 to vector<16x1xf32>
    %18 = arith.divf %16, %17 : vector<16x1xf32>
    %19 = vector.broadcast %11 : vector<16x1xf32> to vector<16x32xf32>
    %20 = arith.subf %7, %19 : vector<16x32xf32>
    %cst_11 = arith.constant 9.99999996E-13 : f32
    %21 = vector.broadcast %cst_11 : f32 to vector<16x1xf32>
    %22 = arith.addf %18, %21 : vector<16x1xf32>
    %23 = math.rsqrt %22 : vector<16x1xf32>
    %24 = vector.broadcast %23 : vector<16x1xf32> to vector<16x32xf32>
    %25 = arith.mulf %20, %24 : vector<16x32xf32>
    %c0_12 = arith.constant 0 : index
    %c0_13 = arith.constant 0 : index
    %26 = vector.load %arg5[%c0_12, %c0_13] : memref<1x32xf32, #tpu.memory_space<vmem>>, vector<1x32xf32>
    %27 = vector.broadcast %26 : vector<1x32xf32> to vector<16x32xf32>
    %28 = arith.mulf %25, %27 : vector<16x32xf32>
    %c0_14 = arith.constant 0 : index
    %c0_15 = arith.constant 0 : index
    %29 = vector.load %arg6[%c0_14, %c0_15] : memref<1x32xf32, #tpu.memory_space<vmem>>, vector<1x32xf32>
    %30 = vector.broadcast %29 : vector<1x32xf32> to vector<16x32xf32>
    %31 = arith.addf %28, %30 : vector<16x32xf32>
    %c0_16 = arith.constant 0 : index
    %c0_17 = arith.constant 0 : index
    %32 = vector.load %arg7[%c0_16, %c0_17] : memref<16x32xf32, #tpu.memory_space<vmem>>, vector<16x32xf32>
    tpu.vector_store %arg7[%c0_16, %c0_17], %31 {strides = array<i32>} : memref<16x32xf32, #tpu.memory_space<vmem>>, vector<16x32xf32>,
    return
  }
  func.func @transform_0(%arg0: i32) -> (i32, i32) {
    %c0_i32 = arith.constant 0 : i32
    %c0_i32_0 = arith.constant 0 : i32
    return %arg0, %c0_i32 : i32, i32
  }
  func.func @transform_1(%arg0: i32) -> (i32, i32) {
    %c0_i32 = arith.constant 0 : i32
    %c0_i32_0 = arith.constant 0 : i32
    %c0_i32_1 = arith.constant 0 : i32
    return %c0_i32, %c0_i32_0 : i32, i32
  }
  func.func @transform_2(%arg0: i32) -> (i32, i32) {
    %c0_i32 = arith.constant 0 : i32
    %c0_i32_0 = arith.constant 0 : i32
    %c0_i32_1 = arith.constant 0 : i32
    return %c0_i32, %c0_i32_0 : i32, i32
  }
  func.func @transform_3(%arg0: i32) -> (i32, i32) {
    %c0_i32 = arith.constant 0 : i32
    %c0_i32_0 = arith.constant 0 : i32
    return %arg0, %c0_i32 : i32, i32
  }
  func.func @transform_4(%arg0: i32) -> (i32, i32) {
    %c0_i32 = arith.constant 0 : i32
    %c0_i32_0 = arith.constant 0 : i32
    %c0_i32_1 = arith.constant 0 : i32
    return %c0_i32, %c0_i32_0 : i32, i32
  }
  func.func @transform_5(%arg0: i32) -> (i32, i32) {
    %c0_i32 = arith.constant 0 : i32
    %c0_i32_0 = arith.constant 0 : i32
    %c0_i32_1 = arith.constant 0 : i32
    return %c0_i32, %c0_i32_0 : i32, i32
  }
  func.func @transform_6(%arg0: i32) -> (i32, i32) {
    %c0_i32 = arith.constant 0 : i32
    %c0_i32_0 = arith.constant 0 : i32
    return %arg0, %c0_i32 : i32, i32
  }
}

module attributes {stable_mosaic.version = 11 : i64} {
  func.func @_flash_attn_kernel(%arg0: i32, %arg1: i32, %arg2: i32, %arg3: i32, %arg4: memref<1x4x8x8xbf16, #tpu.memory_space<vmem>>, %arg5: memref<1x4x8x8xbf16, #tpu.memory_space<vmem>>, %arg6: memref<1x4x8x8xbf16, #tpu.memory_space<vmem>>, %arg7: memref<1x1x8xf32, #tpu.memory_space<vmem>>, %arg8: memref<1x4x8x8xbf16, #tpu.memory_space<vmem>>, %arg9: memref<4x8x1xf32, #tpu.memory_space<vmem>>, %arg10: memref<4x8x1xf32, #tpu.memory_space<vmem>>, %arg11: memref<4x8x8xf32, #tpu.memory_space<vmem>>) attributes {dimension_semantics = [#tpu.dimension_semantics<parallel>, #tpu.dimension_semantics<parallel>, #tpu.dimension_semantics<parallel>, #tpu.dimension_semantics<arbitrary>], iteration_bounds = array<i64: 2, 1, 1, 1>, scalar_prefetch = 0 : i64, scratch_operands = 3 : i64, tpu.core_type = #tpu.core_type<tc>, window_params = [{transform_indices = @transform_0, window_bounds = array<i64: 1, 4, 8, 8>}, {transform_indices = @transform_1, window_bounds = array<i64: 1, 4, 8, 8>}, {transform_indices = @transform_2, window_bounds = array<i64: 1, 4, 8, 8>}, {transform_indices = @transform_3, window_bounds = array<i64: 1, 1, 8>}, {transform_indices = @transform_4, window_bounds = array<i64: 1, 4, 8, 8>}]} {
    %c0_i32 = arith.constant 0 : i32
    %0 = arith.cmpi eq, %arg3, %c0_i32 : i32
    %1 = arith.extui %0 : i1 to i32
    %c0_i32_0 = arith.constant 0 : i32
    %2 = arith.cmpi ne, %1, %c0_i32_0 : i32
    scf.if %2 {
      %cst_39 = arith.constant 0xFF800000 : f32
      %43 = vector.broadcast %cst_39 : f32 to vector<4x8x1xf32>
      %c0_40 = arith.constant 0 : index
      %c0_41 = arith.constant 0 : index
      %c0_42 = arith.constant 0 : index
      %44 = vector.load %arg9[%c0_40, %c0_41, %c0_42] : memref<4x8x1xf32, #tpu.memory_space<vmem>>, vector<4x8x1xf32>
      tpu.vector_store %arg9[%c0_40, %c0_41, %c0_42], %43 {strides = array<i32>} : memref<4x8x1xf32, #tpu.memory_space<vmem>>, vector<4x8x1xf32>,
      %cst_43 = arith.constant 0.000000e+00 : f32
      %45 = vector.broadcast %cst_43 : f32 to vector<4x8x1xf32>
      %c0_44 = arith.constant 0 : index
      %c0_45 = arith.constant 0 : index
      %c0_46 = arith.constant 0 : index
      %46 = vector.load %arg10[%c0_44, %c0_45, %c0_46] : memref<4x8x1xf32, #tpu.memory_space<vmem>>, vector<4x8x1xf32>
      tpu.vector_store %arg10[%c0_44, %c0_45, %c0_46], %45 {strides = array<i32>} : memref<4x8x1xf32, #tpu.memory_space<vmem>>, vector<4x8x1xf32>,
      %cst_47 = arith.constant 0.000000e+00 : f32
      %47 = vector.broadcast %cst_47 : f32 to vector<4x8x8xf32>
      %c0_48 = arith.constant 0 : index
      %c0_49 = arith.constant 0 : index
      %c0_50 = arith.constant 0 : index
      %48 = vector.load %arg11[%c0_48, %c0_49, %c0_50] : memref<4x8x8xf32, #tpu.memory_space<vmem>>, vector<4x8x8xf32>
      tpu.vector_store %arg11[%c0_48, %c0_49, %c0_50], %47 {strides = array<i32>} : memref<4x8x8xf32, #tpu.memory_space<vmem>>, vector<4x8x8xf32>,
    } else {
    }
    %c0 = arith.constant 0 : index
    %c0_1 = arith.constant 0 : index
    %c0_2 = arith.constant 0 : index
    %c0_3 = arith.constant 0 : index
    %3 = vector.load %arg4[%c0, %c0_1, %c0_2, %c0_3] : memref<1x4x8x8xbf16, #tpu.memory_space<vmem>>, vector<1x4x8x8xbf16>
    %4 = vector.shape_cast %3 : vector<1x4x8x8xbf16> to vector<4x8x8xbf16>
    %cst = arith.constant 3.535160e-01 : bf16
    %5 = vector.broadcast %cst : bf16 to vector<4x8x8xbf16>
    %6 = arith.mulf %4, %5 : vector<4x8x8xbf16>
    %c0_4 = arith.constant 0 : index
    %c0_5 = arith.constant 0 : index
    %c0_6 = arith.constant 0 : index
    %c0_7 = arith.constant 0 : index
    %7 = vector.load %arg5[%c0_4, %c0_5, %c0_6, %c0_7] : memref<1x4x8x8xbf16, #tpu.memory_space<vmem>>, vector<1x4x8x8xbf16>
    %8 = vector.shape_cast %7 : vector<1x4x8x8xbf16> to vector<4x8x8xbf16>
    %c0_8 = arith.constant 0 : index
    %c0_9 = arith.constant 0 : index
    %c0_10 = arith.constant 0 : index
    %c0_11 = arith.constant 0 : index
    %9 = vector.load %arg6[%c0_8, %c0_9, %c0_10, %c0_11] : memref<1x4x8x8xbf16, #tpu.memory_space<vmem>>, vector<1x4x8x8xbf16>
    %10 = vector.shape_cast %9 : vector<1x4x8x8xbf16> to vector<4x8x8xbf16>
    %cst_12 = arith.constant dense<0.000000e+00> : vector<4x8x8xf32>
    %11 = tpu.matmul %6, %8, %cst_12 {dimension_numbers = #tpu.dot_dimension_numbers<[2], [2], [1], [1], [0, 0, 0, 1, 1, 1], [0], [0]>} : vector<4x8x8xbf16>, vector<4x8x8xbf16>, vector<4x8x8xf32> -> vector<4x8x8xf32>
    %c0_13 = arith.constant 0 : index
    %c0_14 = arith.constant 0 : index
    %c0_15 = arith.constant 0 : index
    %12 = vector.load %arg7[%c0_13, %c0_14, %c0_15] : memref<1x1x8xf32, #tpu.memory_space<vmem>>, vector<1x1x8xf32>
    %13 = vector.shape_cast %12 : vector<1x1x8xf32> to vector<1x8xf32>
    %14 = vector.shape_cast %13 : vector<1x8xf32> to vector<1x1x8xf32>
    %15 = vector.broadcast %14 : vector<1x1x8xf32> to vector<4x8x8xf32>
    %16 = arith.addf %11, %15 : vector<4x8x8xf32>
    %c0_16 = arith.constant 0 : index
    %c0_17 = arith.constant 0 : index
    %c0_18 = arith.constant 0 : index
    %17 = vector.load %arg9[%c0_16, %c0_17, %c0_18] : memref<4x8x1xf32, #tpu.memory_space<vmem>>, vector<4x8x1xf32>
    %cst_19 = arith.constant dense<0xFF800000> : vector<4x8xf32>
    %18 = vector.multi_reduction <maximumf>, %16, %cst_19 [2] : vector<4x8x8xf32> to vector<4x8xf32>
    %19 = vector.shape_cast %18 : vector<4x8xf32> to vector<4x8x1xf32>
    %20 = arith.maximumf %17, %19 : vector<4x8x1xf32>
    %21 = arith.subf %17, %20 : vector<4x8x1xf32>
    %22 = math.exp %21 : vector<4x8x1xf32>
    %23 = vector.broadcast %20 : vector<4x8x1xf32> to vector<4x8x8xf32>
    %24 = arith.subf %16, %23 : vector<4x8x8xf32>
    %25 = math.exp %24 : vector<4x8x8xf32>
    %c0_20 = arith.constant 0 : index
    %c0_21 = arith.constant 0 : index
    %c0_22 = arith.constant 0 : index
    %26 = vector.load %arg10[%c0_20, %c0_21, %c0_22] : memref<4x8x1xf32, #tpu.memory_space<vmem>>, vector<4x8x1xf32>
    %27 = arith.mulf %22, %26 : vector<4x8x1xf32>
    %cst_23 = arith.constant dense<0.000000e+00> : vector<4x8xf32>
    %28 = vector.multi_reduction <add>, %25, %cst_23 [2] : vector<4x8x8xf32> to vector<4x8xf32>
    %29 = vector.shape_cast %28 : vector<4x8xf32> to vector<4x8x1xf32>
    %30 = arith.addf %27, %29 : vector<4x8x1xf32>
    %c0_24 = arith.constant 0 : index
    %c0_25 = arith.constant 0 : index
    %c0_26 = arith.constant 0 : index
    %31 = vector.load %arg10[%c0_24, %c0_25, %c0_26] : memref<4x8x1xf32, #tpu.memory_space<vmem>>, vector<4x8x1xf32>
    tpu.vector_store %arg10[%c0_24, %c0_25, %c0_26], %30 {strides = array<i32>} : memref<4x8x1xf32, #tpu.memory_space<vmem>>, vector<4x8x1xf32>,
    %32 = arith.truncf %25 : vector<4x8x8xf32> to vector<4x8x8xbf16>
    %cst_27 = arith.constant dense<0.000000e+00> : vector<4x8x8xf32>
    %33 = tpu.matmul %32, %10, %cst_27 {dimension_numbers = #tpu.dot_dimension_numbers<[2], [1], [1], [2], [0, 0, 0, 1, 1, 2], [0], [0]>} : vector<4x8x8xbf16>, vector<4x8x8xbf16>, vector<4x8x8xf32> -> vector<4x8x8xf32>
    %c0_28 = arith.constant 0 : index
    %c0_29 = arith.constant 0 : index
    %c0_30 = arith.constant 0 : index
    %34 = vector.load %arg11[%c0_28, %c0_29, %c0_30] : memref<4x8x8xf32, #tpu.memory_space<vmem>>, vector<4x8x8xf32>
    %35 = vector.broadcast %22 : vector<4x8x1xf32> to vector<4x8x8xf32>
    %36 = arith.mulf %35, %34 : vector<4x8x8xf32>
    %37 = arith.addf %36, %33 : vector<4x8x8xf32>
    %c0_31 = arith.constant 0 : index
    %c0_32 = arith.constant 0 : index
    %c0_33 = arith.constant 0 : index
    %38 = vector.load %arg11[%c0_31, %c0_32, %c0_33] : memref<4x8x8xf32, #tpu.memory_space<vmem>>, vector<4x8x8xf32>
    tpu.vector_store %arg11[%c0_31, %c0_32, %c0_33], %37 {strides = array<i32>} : memref<4x8x8xf32, #tpu.memory_space<vmem>>, vector<4x8x8xf32>,
    %c0_34 = arith.constant 0 : index
    %c0_35 = arith.constant 0 : index
    %c0_36 = arith.constant 0 : index
    %39 = vector.load %arg9[%c0_34, %c0_35, %c0_36] : memref<4x8x1xf32, #tpu.memory_space<vmem>>, vector<4x8x1xf32>
    tpu.vector_store %arg9[%c0_34, %c0_35, %c0_36], %20 {strides = array<i32>} : memref<4x8x1xf32, #tpu.memory_space<vmem>>, vector<4x8x1xf32>,
    %c0_i32_37 = arith.constant 0 : i32
    %40 = arith.cmpi eq, %arg3, %c0_i32_37 : i32
    %41 = arith.extui %40 : i1 to i32
    %c0_i32_38 = arith.constant 0 : i32
    %42 = arith.cmpi ne, %41, %c0_i32_38 : i32
    scf.if %42 {
      %c0_39 = arith.constant 0 : index
      %c0_40 = arith.constant 0 : index
      %c0_41 = arith.constant 0 : index
      %43 = vector.load %arg10[%c0_39, %c0_40, %c0_41] : memref<4x8x1xf32, #tpu.memory_space<vmem>>, vector<4x8x1xf32>
      %44 = tpu.reciprocal %43 {approx = true} : vector<4x8x1xf32> -> vector<4x8x1xf32>
      %c0_42 = arith.constant 0 : index
      %c0_43 = arith.constant 0 : index
      %c0_44 = arith.constant 0 : index
      %45 = vector.load %arg11[%c0_42, %c0_43, %c0_44] : memref<4x8x8xf32, #tpu.memory_space<vmem>>, vector<4x8x8xf32>
      %46 = vector.broadcast %44 : vector<4x8x1xf32> to vector<4x8x8xf32>
      %47 = arith.mulf %45, %46 : vector<4x8x8xf32>
      %48 = arith.truncf %47 : vector<4x8x8xf32> to vector<4x8x8xbf16>
      %c0_45 = arith.constant 0 : index
      %c0_46 = arith.constant 0 : index
      %c0_47 = arith.constant 0 : index
      %c0_48 = arith.constant 0 : index
      %49 = vector.load %arg8[%c0_45, %c0_46, %c0_47, %c0_48] : memref<1x4x8x8xbf16, #tpu.memory_space<vmem>>, vector<1x4x8x8xbf16>
      %50 = vector.shape_cast %49 : vector<1x4x8x8xbf16> to vector<4x8x8xbf16>
      %51 = vector.shape_cast %48 : vector<4x8x8xbf16> to vector<1x4x8x8xbf16>
      tpu.vector_store %arg8[%c0_45, %c0_46, %c0_47, %c0_48], %51 {strides = array<i32>} : memref<1x4x8x8xbf16, #tpu.memory_space<vmem>>, vector<1x4x8x8xbf16>,
    } else {
    }
    return
  }
  func.func @transform_0(%arg0: i32, %arg1: i32, %arg2: i32, %arg3: i32) -> (i32, i32, i32, i32) {
    %c0_i32 = arith.constant 0 : i32
    %c0_i32_0 = arith.constant 0 : i32
    return %arg0, %arg1, %arg2, %c0_i32 : i32, i32, i32, i32
  }
  func.func @transform_1(%arg0: i32, %arg1: i32, %arg2: i32, %arg3: i32) -> (i32, i32, i32, i32) {
    %c0_i32 = arith.constant 0 : i32
    %c0_i32_0 = arith.constant 0 : i32
    return %arg0, %arg1, %arg3, %c0_i32 : i32, i32, i32, i32
  }
  func.func @transform_2(%arg0: i32, %arg1: i32, %arg2: i32, %arg3: i32) -> (i32, i32, i32, i32) {
    %c0_i32 = arith.constant 0 : i32
    %c0_i32_0 = arith.constant 0 : i32
    return %arg0, %arg1, %arg3, %c0_i32 : i32, i32, i32, i32
  }
  func.func @transform_3(%arg0: i32, %arg1: i32, %arg2: i32, %arg3: i32) -> (i32, i32, i32) {
    %c0_i32 = arith.constant 0 : i32
    %c0_i32_0 = arith.constant 0 : i32
    return %arg0, %c0_i32, %arg3 : i32, i32, i32
  }
  func.func @transform_4(%arg0: i32, %arg1: i32, %arg2: i32, %arg3: i32) -> (i32, i32, i32, i32) {
    %c0_i32 = arith.constant 0 : i32
    %c0_i32_0 = arith.constant 0 : i32
    return %arg0, %arg1, %arg2, %c0_i32 : i32, i32, i32, i32
  }
}

module attributes {stable_mosaic.version = 11 : i64} {
  func.func @_linear_resident_kernel(%arg0: i32, %arg1: memref<16x32xbf16, #tpu.memory_space<vmem>>, %arg2: memref<32x64xbf16, #tpu.memory_space<vmem>>, %arg3: memref<1x64xf32, #tpu.memory_space<vmem>>, %arg4: memref<16x64xbf16, #tpu.memory_space<vmem>>) attributes {dimension_semantics = [#tpu.dimension_semantics<parallel>], iteration_bounds = array<i64: 1>, scalar_prefetch = 0 : i64, scratch_operands = 0 : i64, tpu.core_type = #tpu.core_type<tc>, window_params = [{transform_indices = @transform_0, window_bounds = array<i64: 16, 32>}, {pipeline_mode = #tpu.pipeline_mode<synchronous>, transform_indices = @transform_1, window_bounds = array<i64: 32, 64>}, {pipeline_mode = #tpu.pipeline_mode<synchronous>, transform_indices = @transform_2, window_bounds = array<i64: 1, 64>}, {transform_indices = @transform_3, window_bounds = array<i64: 16, 64>}]} {
    %c0 = arith.constant 0 : index
    %c0_0 = arith.constant 0 : index
    %0 = vector.load %arg1[%c0, %c0_0] : memref<16x32xbf16, #tpu.memory_space<vmem>>, vector<16x32xbf16>
    %c0_1 = arith.constant 0 : index
    %c0_2 = arith.constant 0 : index
    %1 = vector.load %arg2[%c0_1, %c0_2] : memref<32x64xbf16, #tpu.memory_space<vmem>>, vector<32x64xbf16>
    %cst = arith.constant dense<0.000000e+00> : vector<16x64xf32>
    %2 = tpu.matmul %0, %1, %cst {dimension_numbers = #tpu.dot_dimension_numbers<[1], [0], [0], [1], [0, 0, 1, 1], [], []>} : vector<16x32xbf16>, vector<32x64xbf16>, vector<16x64xf32> -> vector<16x64xf32>
    %c0_3 = arith.constant 0 : index
    %c0_4 = arith.constant 0 : index
    %3 = vector.load %arg3[%c0_3, %c0_4] : memref<1x64xf32, #tpu.memory_space<vmem>>, vector<1x64xf32>
    %4 = vector.broadcast %3 : vector<1x64xf32> to vector<16x64xf32>
    %5 = arith.addf %2, %4 : vector<16x64xf32>
    %cst_5 = arith.constant 5.000000e-01 : f32
    %6 = vector.broadcast %cst_5 : f32 to vector<16x64xf32>
    %7 = arith.mulf %6, %5 : vector<16x64xf32>
    %cst_6 = arith.constant 0.707106769 : f32
    %8 = vector.broadcast %cst_6 : f32 to vector<16x64xf32>
    %9 = arith.mulf %5, %8 : vector<16x64xf32>
    %10 = math.erf %9 : vector<16x64xf32>
    %cst_7 = arith.constant 1.000000e+00 : f32
    %11 = vector.broadcast %cst_7 : f32 to vector<16x64xf32>
    %12 = arith.addf %11, %10 : vector<16x64xf32>
    %13 = arith.mulf %7, %12 : vector<16x64xf32>
    %14 = arith.truncf %13 : vector<16x64xf32> to vector<16x64xbf16>
    %c0_8 = arith.constant 0 : index
    %c0_9 = arith.constant 0 : index
    %15 = vector.load %arg4[%c0_8, %c0_9] : memref<16x64xbf16, #tpu.memory_space<vmem>>, vector<16x64xbf16>
    tpu.vector_store %arg4[%c0_8, %c0_9], %14 {strides = array<i32>} : memref<16x64xbf16, #tpu.memory_space<vmem>>, vector<16x64xbf16>,
    return
  }
  func.func @transform_0(%arg0: i32) -> (i32, i32) {
    %c0_i32 = arith.constant 0 : i32
    %c0_i32_0 = arith.constant 0 : i32
    return %arg0, %c0_i32 : i32, i32
  }
  func.func @transform_1(%arg0: i32) -> (i32, i32) {
    %c0_i32 = arith.constant 0 : i32
    %c0_i32_0 = arith.constant 0 : i32
    %c0_i32_1 = arith.constant 0 : i32
    return %c0_i32, %c0_i32_0 : i32, i32
  }
  func.func @transform_2(%arg0: i32) -> (i32, i32) {
    %c0_i32 = arith.constant 0 : i32
    %c0_i32_0 = arith.constant 0 : i32
    %c0_i32_1 = arith.constant 0 : i32
    return %c0_i32, %c0_i32_0 : i32, i32
  }
  func.func @transform_3(%arg0: i32) -> (i32, i32) {
    %c0_i32 = arith.constant 0 : i32
    %c0_i32_0 = arith.constant 0 : i32
    return %arg0, %c0_i32 : i32, i32
  }
}

module attributes {stable_mosaic.version = 11 : i64} {
  func.func @_linear_res_ln_resident_kernel(%arg0: i32, %arg1: memref<16x64xbf16, #tpu.memory_space<vmem>>, %arg2: memref<64x32xbf16, #tpu.memory_space<vmem>>, %arg3: memref<1x32xf32, #tpu.memory_space<vmem>>, %arg4: memref<16x32xf32, #tpu.memory_space<vmem>>, %arg5: memref<1x32xf32, #tpu.memory_space<vmem>>, %arg6: memref<1x32xf32, #tpu.memory_space<vmem>>, %arg7: memref<16x32xf32, #tpu.memory_space<vmem>>) attributes {dimension_semantics = [#tpu.dimension_semantics<parallel>], iteration_bounds = array<i64: 1>, scalar_prefetch = 0 : i64, scratch_operands = 0 : i64, tpu.core_type = #tpu.core_type<tc>, window_params = [{transform_indices = @transform_0, window_bounds = array<i64: 16, 64>}, {pipeline_mode = #tpu.pipeline_mode<synchronous>, transform_indices = @transform_1, window_bounds = array<i64: 64, 32>}, {pipeline_mode = #tpu.pipeline_mode<synchronous>, transform_indices = @transform_2, window_bounds = array<i64: 1, 32>}, {transform_indices = @transform_3, window_bounds = array<i64: 16, 32>}, {pipeline_mode = #tpu.pipeline_mode<synchronous>, transform_indices = @transform_4, window_bounds = array<i64: 1, 32>}, {pipeline_mode = #tpu.pipeline_mode<synchronous>, transform_indices = @transform_5, window_bounds = array<i64: 1, 32>}, {transform_indices = @transform_6, window_bounds = array<i64: 16, 32>}]} {
    %c0 = arith.constant 0 : index
    %c0_0 = arith.constant 0 : index
    %0 = vector.load %arg1[%c0, %c0_0] : memref<16x64xbf16, #tpu.memory_space<vmem>>, vector<16x64xbf16>
    %c0_1 = arith.constant 0 : index
    %c0_2 = arith.constant 0 : index
    %1 = vector.load %arg2[%c0_1, %c0_2] : memref<64x32xbf16, #tpu.memory_space<vmem>>, vector<64x32xbf16>
    %cst = arith.constant dense<0.000000e+00> : vector<16x32xf32>
    %2 = tpu.matmul %0, %1, %cst {dimension_numbers = #tpu.dot_dimension_numbers<[1], [0], [0], [1], [0, 0, 1, 1], [], []>} : vector<16x64xbf16>, vector<64x32xbf16>, vector<16x32xf32> -> vector<16x32xf32>
    %c0_3 = arith.constant 0 : index
    %c0_4 = arith.constant 0 : index
    %3 = vector.load %arg3[%c0_3, %c0_4] : memref<1x32xf32, #tpu.memory_space<vmem>>, vector<1x32xf32>
    %4 = vector.broadcast %3 : vector<1x32xf32> to vector<16x32xf32>
    %5 = arith.addf %2, %4 : vector<16x32xf32>
    %c0_5 = arith.constant 0 : index
    %c0_6 = arith.constant 0 : index
    %6 = vector.load %arg4[%c0_5, %c0_6] : memref<16x32xf32, #tpu.memory_space<vmem>>, vector<16x32xf32>
    %7 = arith.addf %5, %6 : vector<16x32xf32>
    %cst_7 = arith.constant dense<0.000000e+00> : vector<16xf32>
    %8 = vector.multi_reduction <add>, %7, %cst_7 [1] : vector<16x32xf32> to vector<16xf32>
    %9 = vector.shape_cast %8 : vector<16xf32> to vector<16x1xf32>
    %cst_8 = arith.constant 3.200000e+01 : f32
    %10 = vector.broadcast %cst_8 : f32 to vector<16x1xf32>
    %11 = arith.divf %9, %10 : vector<16x1xf32>
    %12 = vector.broadcast %11 : vector<16x1xf32> to vector<16x32xf32>
    %13 = arith.subf %7, %12 : vector<16x32xf32>
    %14 = arith.mulf %13, %13 : vector<16x32xf32>
    %cst_9 = arith.constant dense<0.000000e+00> : vector<16xf32>
    %15 = vector.multi_reduction <add>, %14, %cst_9 [1] : vector<16x32xf32> to vector<16xf32>
    %16 = vector.shape_cast %15 : vector<16xf32> to vector<16x1xf32>
    %cst_10 = arith.constant 3.200000e+01 : f32
    %17 = vector.broadcast %cst_10 : f32 to vector<16x1xf32>
    %18 = arith.divf %16, %17 : vector<16x1xf32>
    %19 = vector.broadcast %11 : vector<16x1xf32> to vector<16x32xf32>
    %20 = arith.subf %7, %19 : vector<16x32xf32>
    %cst_11 = arith.constant 9.99999996E-13 : f32
    %21 = vector.broadcast %cst_11 : f32 to vector<16x1xf32>
    %22 = arith.addf %18, %21 : vector<16x1xf32>
    %23 = math.rsqrt %22 : vector<16x1xf32>
    %24 = vector.broadcast %23 : vector<16x1xf32> to vector<16x32xf32>
    %25 = arith.mulf %20, %24 : vector<16x32xf32>
    %c0_12 = arith.constant 0 : index
    %c0_13 = arith.constant 0 : index
    %26 = vector.load %arg5[%c0_12, %c0_13] : memref<1x32xf32, #tpu.memory_space<vmem>>, vector<1x32xf32>
    %27 = vector.broadcast %26 : vector<1x32xf32> to vector<16x32xf32>
    %28 = arith.mulf %25, %27 : vector<16x32xf32>
    %c0_14 = arith.constant 0 : index
    %c0_15 = arith.constant 0 : index
    %29 = vector.load %arg6[%c0_14, %c0_15] : memref<1x32xf32, #tpu.memory_space<vmem>>, vector<1x32xf32>
    %30 = vector.broadcast %29 : vector<1x32xf32> to vector<16x32xf32>
    %31 = arith.addf %28, %30 : vector<16x32xf32>
    %c0_16 = arith.constant 0 : index
    %c0_17 = arith.constant 0 : index
    %32 = vector.load %arg7[%c0_16, %c0_17] : memref<16x32xf32, #tpu.memory_space<vmem>>, vector<16x32xf32>
    tpu.vector_store %arg7[%c0_16, %c0_17], %31 {strides = array<i32>} : memref<16x32xf32, #tpu.memory_space<vmem>>, vector<16x32xf32>,
    return
  }
  func.func @transform_0(%arg0: i32) -> (i32, i32) {
    %c0_i32 = arith.constant 0 : i32
    %c0_i32_0 = arith.constant 0 : i32
    return %arg0, %c0_i32 : i32, i32
  }
  func.func @transform_1(%arg0: i32) -> (i32, i32) {
    %c0_i32 = arith.constant 0 : i32
    %c0_i32_0 = arith.constant 0 : i32
    %c0_i32_1 = arith.constant 0 : i32
    return %c0_i32, %c0_i32_0 : i32, i32
  }
  func.func @transform_2(%arg0: i32) -> (i32, i32) {
    %c0_i32 = arith.constant 0 : i32
    %c0_i32_0 = arith.constant 0 : i32
    %c0_i32_1 = arith.constant 0 : i32
    return %c0_i32, %c0_i32_0 : i32, i32
  }
  func.func @transform_3(%arg0: i32) -> (i32, i32) {
    %c0_i32 = arith.constant 0 : i32
    %c0_i32_0 = arith.constant 0 : i32
    return %arg0, %c0_i32 : i32, i32
  }
  func.func @transform_4(%arg0: i32) -> (i32, i32) {
    %c0_i32 = arith.constant 0 : i32
    %c0_i32_0 = arith.constant 0 : i32
    %c0_i32_1 = arith.constant 0 : i32
    return %c0_i32, %c0_i32_0 : i32, i32
  }
  func.func @transform_5(%arg0: i32) -> (i32, i32) {
    %c0_i32 = arith.constant 0 : i32
    %c0_i32_0 = arith.constant 0 : i32
    %c0_i32_1 = arith.constant 0 : i32
    return %c0_i32, %c0_i32_0 : i32, i32
  }
  func.func @transform_6(%arg0: i32) -> (i32, i32) {
    %c0_i32 = arith.constant 0 : i32
    %c0_i32_0 = arith.constant 0 : i32
    return %arg0, %c0_i32 : i32, i32
  }
}

module attributes {stable_mosaic.version = 11 : i64} {
  func.func @_linear_res_ln_resident_kernel(%arg0: i32, %arg1: memref<16x64xbf16, #tpu.memory_space<vmem>>, %arg2: memref<64x32xbf16, #tpu.memory_space<vmem>>, %arg3: memref<1x32xf32, #tpu.memory_space<vmem>>, %arg4: memref<16x32xf32, #tpu.memory_space<vmem>>, %arg5: memref<1x32xf32, #tpu.memory_space<vmem>>, %arg6: memref<1x32xf32, #tpu.memory_space<vmem>>, %arg7: memref<16x32xf32, #tpu.memory_space<vmem>>) attributes {dimension_semantics = [#tpu.dimension_semantics<parallel>], iteration_bounds = array<i64: 1>, scalar_prefetch = 0 : i64, scratch_operands = 0 : i64, tpu.core_type = #tpu.core_type<tc>, window_params = [{transform_indices = @transform_0, window_bounds = array<i64: 16, 64>}, {pipeline_mode = #tpu.pipeline_mode<synchronous>, transform_indices = @transform_1, window_bounds = array<i64: 64, 32>}, {pipeline_mode = #tpu.pipeline_mode<synchronous>, transform_indices = @transform_2, window_bounds = array<i64: 1, 32>}, {transform_indices = @transform_3, window_bounds = array<i64: 16, 32>}, {pipeline_mode = #tpu.pipeline_mode<synchronous>, transform_indices = @transform_4, window_bounds = array<i64: 1, 32>}, {pipeline_mode = #tpu.pipeline_mode<synchronous>, transform_indices = @transform_5, window_bounds = array<i64: 1, 32>}, {transform_indices = @transform_6, window_bounds = array<i64: 16, 32>}]} {
    %c0 = arith.constant 0 : index
    %c0_0 = arith.constant 0 : index
    %0 = vector.load %arg1[%c0, %c0_0] : memref<16x64xbf16, #tpu.memory_space<vmem>>, vector<16x64xbf16>
    %c0_1 = arith.constant 0 : index
    %c0_2 = arith.constant 0 : index
    %1 = vector.load %arg2[%c0_1, %c0_2] : memref<64x32xbf16, #tpu.memory_space<vmem>>, vector<64x32xbf16>
    %cst = arith.constant dense<0.000000e+00> : vector<16x32xf32>
    %2 = tpu.matmul %0, %1, %cst {dimension_numbers = #tpu.dot_dimension_numbers<[1], [0], [0], [1], [0, 0, 1, 1], [], []>} : vector<16x64xbf16>, vector<64x32xbf16>, vector<16x32xf32> -> vector<16x32xf32>
    %c0_3 = arith.constant 0 : index
    %c0_4 = arith.constant 0 : index
    %3 = vector.load %arg3[%c0_3, %c0_4] : memref<1x32xf32, #tpu.memory_space<vmem>>, vector<1x32xf32>
    %4 = vector.broadcast %3 : vector<1x32xf32> to vector<16x32xf32>
    %5 = arith.addf %2, %4 : vector<16x32xf32>
    %c0_5 = arith.constant 0 : index
    %c0_6 = arith.constant 0 : index
    %6 = vector.load %arg4[%c0_5, %c0_6] : memref<16x32xf32, #tpu.memory_space<vmem>>, vector<16x32xf32>
    %7 = arith.addf %5, %6 : vector<16x32xf32>
    %cst_7 = arith.constant dense<0.000000e+00> : vector<16xf32>
    %8 = vector.multi_reduction <add>, %7, %cst_7 [1] : vector<16x32xf32> to vector<16xf32>
    %9 = vector.shape_cast %8 : vector<16xf32> to vector<16x1xf32>
    %cst_8 = arith.constant 3.200000e+01 : f32
    %10 = vector.broadcast %cst_8 : f32 to vector<16x1xf32>
    %11 = arith.divf %9, %10 : vector<16x1xf32>
    %12 = vector.broadcast %11 : vector<16x1xf32> to vector<16x32xf32>
    %13 = arith.subf %7, %12 : vector<16x32xf32>
    %14 = arith.mulf %13, %13 : vector<16x32xf32>
    %cst_9 = arith.constant dense<0.000000e+00> : vector<16xf32>
    %15 = vector.multi_reduction <add>, %14, %cst_9 [1] : vector<16x32xf32> to vector<16xf32>
    %16 = vector.shape_cast %15 : vector<16xf32> to vector<16x1xf32>
    %cst_10 = arith.constant 3.200000e+01 : f32
    %17 = vector.broadcast %cst_10 : f32 to vector<16x1xf32>
    %18 = arith.divf %16, %17 : vector<16x1xf32>
    %19 = vector.broadcast %11 : vector<16x1xf32> to vector<16x32xf32>
    %20 = arith.subf %7, %19 : vector<16x32xf32>
    %cst_11 = arith.constant 9.99999996E-13 : f32
    %21 = vector.broadcast %cst_11 : f32 to vector<16x1xf32>
    %22 = arith.addf %18, %21 : vector<16x1xf32>
    %23 = math.rsqrt %22 : vector<16x1xf32>
    %24 = vector.broadcast %23 : vector<16x1xf32> to vector<16x32xf32>
    %25 = arith.mulf %20, %24 : vector<16x32xf32>
    %c0_12 = arith.constant 0 : index
    %c0_13 = arith.constant 0 : index
    %26 = vector.load %arg5[%c0_12, %c0_13] : memref<1x32xf32, #tpu.memory_space<vmem>>, vector<1x32xf32>
    %27 = vector.broadcast %26 : vector<1x32xf32> to vector<16x32xf32>
    %28 = arith.mulf %25, %27 : vector<16x32xf32>
    %c0_14 = arith.constant 0 : index
    %c0_15 = arith.constant 0 : index
    %29 = vector.load %arg6[%c0_14, %c0_15] : memref<1x32xf32, #tpu.memory_space<vmem>>, vector<1x32xf32>
    %30 = vector.broadcast %29 : vector<1x32xf32> to vector<16x32xf32>
    %31 = arith.addf %28, %30 : vector<16x32xf32>
    %c0_16 = arith.constant 0 : index
    %c0_17 = arith.constant 0 : index
    %32 = vector.load %arg7[%c0_16, %c0_17] : memref<16x32xf32, #tpu.memory_space<vmem>>, vector<16x32xf32>
    tpu.vector_store %arg7[%c0_16, %c0_17], %31 {strides = array<i32>} : memref<16x32xf32, #tpu.memory_space<vmem>>, vector<16x32xf32>,
    return
  }
  func.func @transform_0(%arg0: i32) -> (i32, i32) {
    %c0_i32 = arith.constant 0 : i32
    %c0_i32_0 = arith.constant 0 : i32
    return %arg0, %c0_i32 : i32, i32
  }
  func.func @transform_1(%arg0: i32) -> (i32, i32) {
    %c0_i32 = arith.constant 0 : i32
    %c0_i32_0 = arith.constant 0 : i32
    %c0_i32_1 = arith.constant 0 : i32
    return %c0_i32, %c0_i32_0 : i32, i32
  }
  func.func @transform_2(%arg0: i32) -> (i32, i32) {
    %c0_i32 = arith.constant 0 : i32
    %c0_i32_0 = arith.constant 0 : i32
    %c0_i32_1 = arith.constant 0 : i32
    return %c0_i32, %c0_i32_0 : i32, i32
  }
  func.func @transform_3(%arg0: i32) -> (i32, i32) {
    %c0_i32 = arith.constant 0 : i32
    %c0_i32_0 = arith.constant 0 : i32
    return %arg0, %c0_i32 : i32, i32
  }
  func.func @transform_4(%arg0: i32) -> (i32, i32) {
    %c0_i32 = arith.constant 0 : i32
    %c0_i32_0 = arith.constant 0 : i32
    %c0_i32_1 = arith.constant 0 : i32
    return %c0_i32, %c0_i32_0 : i32, i32
  }
  func.func @transform_5(%arg0: i32) -> (i32, i32) {
    %c0_i32 = arith.constant 0 : i32
    %c0_i32_0 = arith.constant 0 : i32
    %c0_i32_1 = arith.constant 0 : i32
    return %c0_i32, %c0_i32_0 : i32, i32
  }
  func.func @transform_6(%arg0: i32) -> (i32, i32) {
    %c0_i32 = arith.constant 0 : i32
    %c0_i32_0 = arith.constant 0 : i32
    return %arg0, %c0_i32 : i32, i32
  }
}

</mosaic_0001>

<bundles_post_ra>
// kernel: bert_encoder_forward.10
= control target key start
LH: loop header
LB: loop body
LE: loop exit
PB: predicated region body
PF: predicated region fallthrough
CT: control target
= control target key end

     0   :  { %vm42_vm0 = vcmask 261120   ;;  %vm62_vm1 = vcmask 781312   ;;  %s124_s1 = inlined_call_operand.vmem [shape: bf16[32,96], index: 1, kind: input, shape index: {}]   ;;  %s125_s2 = inlined_call_operand.vmem [shape: f32[1,96], index: 2, kind: input, shape index: {}]   ;;  %s126_s0 = inlined_call_operand.vmem [shape: bf16[16,32], index: 0, kind: input, shape index: {}]   ;;  %s127_s3 = inlined_call_operand.vmem [shape: bf16[16,96], index: 3, kind: output, shape index: {}]  }
   0x1   :  { %v84_v0 = vld [vmem:[%s124_s1 + $0x8] sm:$0xff]  ;;  %v83_v1 = vld [vmem:[%s124_s1] sm:$0xff] }
   0x2   :  { %52 = vmatpush.bf16.msra.mxu0 %v84_v0  ;;  %v82_v2 = vld [vmem:[%s126_s0] sm:$0xff] }
   0x3   :  { %v85_v3 = vld [vmem:[%s125_s2] ss:$0 sm:$0xff] }
   0x6   :  { %53 = vmatpush.bf16.msra.mxu0 %v83_v1 }
   0x9   :  { %81 = vmatmul.msk.bf16.vlgmr.msra.gmra.mxu0 %vm42_vm0, %v82_v2 }
  0x86   :  { %v55_v4 = vpop.f32.mrf.mxu0 }
  0x87   :  { %v56_v5 = vadd.f32 %v85_v3, %v55_v4 }
  0x89   :  { %v60_v6 = vpack.c.bf16 %v56_v5, %v56_v5 }
  0x8b   :  { %63 = vst.msk [vmem:[%s127_s3] sm:$0xf] %vm62_vm1, %v60_v6 }
  0x8e   :  { %v57_v7 = vpop.f32.mrf.mxu0 }
  0x8f   :  { %v58_v8 = vadd.f32 %v85_v3, %v57_v7 }
  0x91   :  { %v61_v9 = vpack.c.bf16 %v58_v8, %v58_v8 }
  0x93   :  { %64 = vst.msk [vmem:[%s127_s3 + $0x4] sm:$0xf] %vm62_vm1, %v61_v9 }

// kernel: bert_encoder_forward.12
= control target key start
LH: loop header
LB: loop body
LE: loop exit
PB: predicated region body
PF: predicated region fallthrough
CT: control target
= control target key end

     0   :  { %vm51_vm0 = vcmask 261120   ;;  %v168_v14 = vmov 32.0   ;;  %s241_s1 = inlined_call_operand.vmem [shape: bf16[32,32], index: 1, kind: input, shape index: {}]   ;;  %s242_s2 = inlined_call_operand.vmem [shape: f32[1,32], index: 2, kind: input, shape index: {}]   ;;  %s243_s0 = inlined_call_operand.vmem [shape: bf16[16,32], index: 0, kind: input, shape index: {}]   ;;  %s244_s3 = inlined_call_operand.vmem [shape: f32[16,32], index: 3, kind: input, shape index: {}]   ;;  %s245_s4 = inlined_call_operand.vmem [shape: f32[1,32], index: 4, kind: input, shape index: {}]   ;;  %s246_s5 = inlined_call_operand.vmem [shape: f32[1,32], index: 5, kind: input, shape index: {}]   ;;  %s247_s6 = inlined_call_operand.vmem [shape: f32[16,32], index: 6, kind: output, shape index: {}]  }
   0x1   :  { %v157_v0 = vld [vmem:[%s241_s1 + $0x8] sm:$0xff]  ;;  %v156_v1 = vld [vmem:[%s241_s1] sm:$0xff]  ;;  %162 = vrcp.f32 %v168_v14 }
   0x2   :  { %61 = vmatpush.bf16.msra.mxu0 %v157_v0  ;;  %v155_v2 = vld [vmem:[%s243_s0] sm:$0xff]  ;;  %v70_v10 = vld [vmem:[%s244_s3 + $0x8] sm:$0xff] }
   0x3   :  { %v159_v3 = vld [vmem:[%s242_s2] ss:$0 sm:$0xff] }
   0x4   :  { %v69_v5 = vld [vmem:[%s244_s3] sm:$0xff] }
   0x5   :  { %v160_v45 = vld [vmem:[%s245_s4] ss:$0 sm:$0xff] }
   0x6   :  { %62 = vmatpush.bf16.msra.mxu0 %v156_v1  ;;  %v161_v48 = vld [vmem:[%s246_s5] ss:$0 sm:$0xff] }
   0x7   :  { %v163_v15 = vpop.eup %162 }
   0x8   :  { %v80_v16 = vmul.f32 32.0, %v163_v15  ;;  %vm84_vm1 = vweird.f32 %v163_v15 }
   0x9   :  { %154 = vmatmul.msk.bf16.vlgmr.msra.gmra.mxu0 %vm51_vm0, %v155_v2 }
   0xa   :  { %v81_v17 = vsub.f32 1.0, %v80_v16 }
   0xc   :  { %v82_v18 = vmul.f32 %v163_v15, %v81_v17 }
   0xe   :  { %v83_v19 = vadd.f32 %v163_v15, %v82_v18 }
  0x10   :  { %v85_v20 = vsel %vm84_vm1, %v163_v15, %v83_v19 }
  0x86   :  { %v64_v4 = vpop.f32.mrf.mxu0 }
  0x87   :  { %v65_v6 = vadd.f32 %v159_v3, %v64_v4 }
  0x89   :  { %v71_v7 = vadd.f32 %v69_v5, %v65_v6 }
  0x8b   :  { %v73_v8 = vsel %vm51_vm0, %v71_v7, 0.0 }
  0x8c   :  { %74 = vadd.xlane.f32.xlu0 %v73_v8 }
  0x8e   :  { %v66_v9 = vpop.f32.mrf.mxu0 }
  0x8f   :  { %v67_v11 = vadd.f32 %v159_v3, %v66_v9 }
  0x91   :  { %v72_v12 = vadd.f32 %v70_v10, %v67_v11 }
  0x93   :  { %v76_v13 = vsel %vm51_vm0, %v72_v12, 0.0 }
  0x94   :  { %77 = vadd.xlane.f32.xlu0 %v76_v13 }
  0xff   :  { %v75_v21 = vpop.xlane.xlu0 %74 }
 0x100   :  { %v86_v22 = vmul.f32 %v85_v20, %v75_v21 }
 0x102   :  { %v88_v23 = vsub.f32 %v71_v7, %v86_v22 }
 0x104   :  { %v90_v24 = vmul.f32 %v88_v23, %v88_v23 }
 0x106   :  { %v92_v25 = vsel %vm51_vm0, %v90_v24, 0.0 }
 0x107   :  { %93 = vadd.xlane.f32.xlu1 %v92_v25  ;;  %v78_v26 = vpop.xlane.xlu0 %77 }
 0x108   :  { %v87_v27 = vmul.f32 %v85_v20, %v78_v26 }
 0x10a   :  { %v89_v28 = vsub.f32 %v72_v12, %v87_v27 }
 0x10c   :  { %v91_v29 = vmul.f32 %v89_v28, %v89_v28 }
 0x10e   :  { %v95_v30 = vsel %vm51_vm0, %v91_v29, 0.0 }
 0x10f   :  { %96 = vadd.xlane.f32.xlu1 %v95_v30 }
 0x17a   :  { %v94_v31 = vpop.xlane.xlu1 %93 }
 0x17b   :  { %v98_v32 = vmul.f32 %v94_v31, %v85_v20 }
 0x17d   :  { %v100_v33 = vadd.f32 1e-12, %v98_v32 }
 0x17f   :  { %164 = vrsqrt.f32 %v100_v33  ;;  %vm108_vm3 = vweird.f32 %v100_v33 }
 0x182   :  { %v97_v34 = vpop.xlane.xlu1 %96 }
 0x183   :  { %v99_v35 = vmul.f32 %v97_v34, %v85_v20 }
 0x185   :  { %v165_v36 = vpop.eup %164  ;;  %v101_v37 = vadd.f32 1e-12, %v99_v35 }
 0x186   :  { %v103_v38 = vmul.f32 %v165_v36, %v100_v33  ;;  %vm109_vm2 = vweird.f32 %v165_v36 }
 0x187   :  { %166 = vrsqrt.f32 %v101_v37  ;;  %vm110_vm4 = vmor %vm108_vm3, %vm109_vm2  ;;  %vm118_vm6 = vweird.f32 %v101_v37 }
 0x188   :  { %v104_v39 = vmul.f32 %v165_v36, %v103_v38 }
 0x18a   :  { %v105_v40 = vmul.f32 0.5, %v104_v39 }
 0x18c   :  { %v106_v41 = vsub.f32 1.5, %v105_v40 }
 0x18d   :  { %v167_v42 = vpop.eup %166 }
 0x18e   :  { %v107_v43 = vmul.f32 %v165_v36, %v106_v41  ;;  %v113_v44 = vmul.f32 %v167_v42, %v101_v37  ;;  %vm119_vm5 = vweird.f32 %v167_v42 }
 0x18f   :  { %vm120_vm7 = vmor %vm118_vm6, %vm119_vm5 }
 0x190   :  { %v111_v46 = vsel %vm110_vm4, %v165_v36, %v107_v43  ;;  %v114_v47 = vmul.f32 %v167_v42, %v113_v44 }
 0x191   :  { %v122_v49 = vmul.f32 %v111_v46, %v88_v23 }
 0x192   :  { %v115_v50 = vmul.f32 0.5, %v114_v47 }
 0x193   :  { %v128_v51 = vmul.f32 %v160_v45, %v122_v49 }
 0x194   :  { %v116_v52 = vsub.f32 1.5, %v115_v50 }
 0x195   :  { %v134_v53 = vadd.f32 %v161_v48, %v128_v51 }
 0x196   :  { %v117_v54 = vmul.f32 %v167_v42, %v116_v52 }
 0x197   :  { %136 = vst.msk [vmem:[%s247_s6] sm:$0xff] %vm51_vm0, %v134_v53 }
 0x198   :  { %v121_v55 = vsel %vm120_vm7, %v167_v42, %v117_v54 }
 0x199   :  { %v123_v56 = vmul.f32 %v121_v55, %v89_v28 }
 0x19b   :  { %v129_v57 = vmul.f32 %v160_v45, %v123_v56 }
 0x19d   :  { %v135_v58 = vadd.f32 %v161_v48, %v129_v57 }
 0x19f   :  { %137 = vst.msk [vmem:[%s247_s6 + $0x8] sm:$0xff] %vm51_vm0, %v135_v58 }

// kernel: bert_encoder_forward.11
= control target key start
LH: loop header
LB: loop body
LE: loop exit
PB: predicated region body
PF: predicated region fallthrough
CT: control target
= control target key end

     0   :  { %s1078_s15 = smov 0   ;;  %s1080_s16 = smov 0   ;;  %s1236_s0 = inlined_call_operand.vmem [shape: bf16[2,4,8,8], index: 0, kind: input, shape index: {}]   ;;  %s1237_s1 = inlined_call_operand.vmem [shape: bf16[2,4,8,8], index: 1, kind: input, shape index: {}]   ;;  %s1238_s2 = inlined_call_operand.vmem [shape: bf16[2,4,8,8], index: 2, kind: input, shape index: {}]   ;;  %s1239_s3 = inlined_call_operand.vmem [shape: f32[2,1,8], index: 3, kind: input, shape index: {}]   ;;  %s1240_s4 = inlined_call_operand.vmem [shape: bf16[2,4,8,8], index: 4, kind: output, shape index: {}]  }
   0x1   :  { %s1082_s17 = smov 0  }
   0x2 LB: > { %s40_s18 = sadd.s32 1, %s1044_s16  ;;  %p939_p0 = scmp.ge.s32.totalorder %s1048_s17, 1  ;;  %s1048_s17 = sphi %s1082_s17, %s14_s17   ;;  %s1044_s16 = sphi %s1080_s16, %s1242_s16   ;;  %s1040_s15 = sphi %s1078_s15, %s1241_s15  }
   0x3   : > { %p42_p1 = scmp.ge.s32.totalorder %s40_s18, 2  ;;  %p261_p2 = scmp.lt.s32.totalorder %s1048_s17, 3 }
   0x5   : > { %s1244_s18 = smov (%p42_p1, %s40_s18), 0  ;;  %p262_p3 = pnand %p939_p0, %p261_p2 }
   0x6   : > { %p332_p4 = scmp.lt.s32.totalorder (!%p262_p3), %s1040_s15, 1 }
   0x7   : > { %265 = sbr.rel (%p262_p3) target bundleno = 700 (0x2bc), region = 36 }
   0xc   : > { %s1246_s15 = smov (!%p332_p4, %s1040_s15), 1  ;;  %vm403_vm0 = vcmask 64512   ;;  %vm394_vm1 = vcmask 7168   ;;  %v1050_v22 = vmov -inf   ;;  %v1051_v40 = vmov 0  }
   0xd   : > { %s1099_s19 = sshll.u32 %s1246_s15, 4  ;;  %s375_s22 = scalar_lea.vmem %s1239_s3, %s1246_s15  ;;  %395 = vst.msk [vmem:[#allocation2] sm:$0xff] %vm394_vm1, %v1050_v22  ;;  %999 = vset.pattern.permute.xlu0 %v1051_v40  ;;  %998 = vset.pattern.permute.xlu2 %v1051_v40  ;;  %v1052_v41 = vmov 0.0   ;;  %vm613_vm2 = vcmask 1043456   ;;  %vm770_vm3 = vcmask 60416  }
   0xe   : > { %s355_s25 = scalar_lea.vmem %s1237_s1, %s1099_s19  ;;  %s342_s28 = scalar_lea.vmem %s1236_s0, %s1099_s19  ;;  %396 = vst.msk [vmem:[#allocation2 + $0x8] sm:$0xff] %vm394_vm1, %v1050_v22  ;;  %v1001_v23 = vld [vmem:[%s375_s22] ss:$0 sm:$0xff]  ;;  %1000 = vset.pattern.permute.xlu1 %v1051_v40 }
   0xf   : > { %v424_v0 = vld [vmem:[%s355_s25] sm:$0xf]  ;;  %v426_v1 = vld [vmem:[%s355_s25 + $0x8] sm:$0xf]  ;;  %v425_v7 = vld [vmem:[%s355_s25 + $0x4] sm:$0xf]  ;;  %s368_s7 = scalar_lea.vmem %s1238_s2, %s1099_s19  ;;  %s387_s10 = scalar_lea.vmem %s1240_s4, %s1099_s19 }
  0x10   : > { %v963_v2 = vld [vmem:[%s342_s28] sm:$0xff]   ;;  %v441_v3 = vsel %vm403_vm0, %v424_v0, 0  ;;  %v479_v4 = vsel %vm403_vm0, %v426_v1, 0  ;;  %v970_v6 = vld [vmem:[%s342_s28 + $0x8] sm:$0xff]   ;;  %v460_v10 = vsel %vm403_vm0, %v425_v7, 0  ;;  %397 = vst.msk [vmem:[#allocation2 + $0x10] sm:$0xff] %vm394_vm1, %v1050_v22 }
  0x11   : > { %v964_v5 = vunpack.c.l.bf16 %v963_v2  ;;  %v965_v8 = vunpack.c.h.bf16 %v963_v2  ;;  %450 = vmatpush.bf16.xpose.msra.mxu0 %v441_v3  ;;  %488 = vmatpush.bf16.xpose.msra.mxu2 %v479_v4  ;;  %v968_v9 = vunpack.c.l.bf16 %v970_v6  ;;  %v427_v11 = vld [vmem:[%s355_s25 + $0xc] sm:$0xf]  ;;  %v969_v12 = vunpack.c.h.bf16 %v970_v6  ;;  %398 = vst.msk [vmem:[#allocation2 + $0x18] sm:$0xff] %vm394_vm1, %v1050_v22  ;;  %v430_v58 = vld [vmem:[%s368_s7 + $0x8] sm:$0xf] }
  0x12   : > { %469 = vmatpush.bf16.xpose.msra.mxu1 %v460_v10  ;;  %v498_v14 = vsel %vm403_vm0, %v427_v11, 0  ;;  %401 = vst.msk [vmem:[#allocation3 + $0x10] sm:$0xff] %vm394_vm1, %v1052_v41  ;;  %v653_v59 = vsel %vm613_vm2, %v430_v58, 0  ;;  %v431_v60 = vld [vmem:[%s368_s7 + $0xc] sm:$0xf] }
  0x13   : > { %v416_v13 = vmul.f32 0.35351563, %v964_v5  ;;  %v417_v15 = vmul.f32 0.35351563, %v965_v8  ;;  %v418_v16 = vmul.f32 0.35351563, %v968_v9  ;;  %507 = vmatpush.bf16.xpose.msra.mxu3 %v498_v14  ;;  %v419_v17 = vmul.f32 0.35351563, %v969_v12  ;;  %399 = vst.msk [vmem:[#allocation3] sm:$0xff] %vm394_vm1, %v1052_v41 }
  0x14   : > { %400 = vst.msk [vmem:[#allocation3 + $0x8] sm:$0xff] %vm394_vm1, %v1052_v41  ;;  %v1154_v42 = vld [vmem:[#allocation2] sm:$0xff]  ;;  %v672_v61 = vsel %vm613_vm2, %v431_v60, 0 }
  0x15   : > { %v420_v18 = vpack.c.bf16 %v416_v13, %v416_v13  ;;  %v422_v19 = vpack.c.bf16 %v418_v16, %v418_v16  ;;  %v421_v20 = vpack.c.bf16 %v417_v15, %v417_v15  ;;  %v423_v21 = vpack.c.bf16 %v419_v17, %v419_v17  ;;  %402 = vst.msk [vmem:[#allocation3 + $0x18] sm:$0xff] %vm394_vm1, %v1052_v41  ;;  %v1166_v48 = vld [vmem:[#allocation2 + $0x8] sm:$0xff]  ;;  %v428_v62 = vld [vmem:[%s368_s7] sm:$0xf]  ;;  %v429_v1 = vld [vmem:[%s368_s7 + $0x4] sm:$0xf] }
  0x16   : > { %404 = vst.msk [vmem:[#allocation4] sm:$0xff] %vm403_vm0, %v1052_v41  ;;  %v615_v63 = vsel %vm613_vm2, %v428_v62, 0  ;;  %v634_v3 = vsel %vm613_vm2, %v429_v1, 0 }
  0x17   : > { %405 = vst.msk [vmem:[#allocation4 + $0x8] sm:$0xff] %vm403_vm0, %v1052_v41  ;;  %v1164_v46 = vld [vmem:[#allocation2 + $0x10] sm:$0xff] }
  0x18   : > { %948 = vmatmul.msk.bf16.vlgmr.msra.gmra.mxu0 %vm403_vm0, %v420_v18  ;;  %950 = vmatmul.msk.bf16.vlgmr.msra.gmra.mxu2 %vm403_vm0, %v422_v19  ;;  %406 = vst.msk [vmem:[#allocation4 + $0x10] sm:$0xff] %vm403_vm0, %v1052_v41  ;;  %v1179_v54 = vld [vmem:[#allocation2 + $0x18] sm:$0xff] }
  0x19   : > { %949 = vmatmul.msk.bf16.vlgmr.msra.gmra.mxu1 %vm403_vm0, %v421_v20  ;;  %407 = vst.msk [vmem:[#allocation4 + $0x18] sm:$0xff] %vm403_vm0, %v1052_v41  ;;  %662 = vmatpush.bf16.msrb.mxu2 %v653_v59 }
  0x1a   : > { %951 = vmatmul.msk.bf16.vlgmr.msra.gmra.mxu3 %vm403_vm0, %v423_v21  ;;  %624 = vmatpush.bf16.msrb.mxu0 %v615_v63 }
  0x1b   : > { %681 = vmatpush.bf16.msrb.mxu3 %v672_v61  ;;  %643 = vmatpush.bf16.msrb.mxu1 %v634_v3 }
  0x95   : > { %v452_v24 = vpop.f32.mrf.mxu0 }
  0x96   : > { %v1130_v25 = vadd.f32 %v1001_v23, %v452_v24  ;;  %v471_v26 = vpop.f32.mrf.mxu1 }
  0x97   : > { %v1134_v28 = vadd.f32 %v1001_v23, %v471_v26 }
  0x98   : > { %v517_v27 = vsel %vm403_vm0, %v1130_v25, -inf }
  0x99   : > { %518 = vmax.xlane.f32.xlu1 %v517_v27  ;;  %v520_v34 = vsel %vm403_vm0, %v1134_v28, -inf }
  0x9b   : > { %v490_v29 = vpop.f32.mrf.mxu2 }
  0x9c   : > { %v1136_v30 = vadd.f32 %v1001_v23, %v490_v29 }
  0x9d   : > { %v454_v31 = vpop.f32.mrf.mxu0  ;;  %v509_v32 = vpop.f32.mrf.mxu3 }
  0x9e   : > { %v523_v33 = vsel %vm403_vm0, %v1136_v30, -inf  ;;  %v473_v35 = vpop.f32.mrf.mxu1  ;;  %v1142_v36 = vadd.f32 %v1001_v23, %v509_v32 }
  0x9f   : > { %524 = vmax.xlane.f32.xlu0 %v523_v33  ;;  %v579_v33 = vld [vmem:[#allocation3 + $0x10] sm:$0xff] }
  0xa0   : > { %v526_v38 = vsel %vm403_vm0, %v1142_v36, -inf }
  0xa1   : > { %521 = vmax.xlane.f32.xlu1 %v520_v34 }
  0xa3   : > { %v492_v37 = vpop.f32.mrf.mxu2 }
  0xa5   : > { %v511_v39 = vpop.f32.mrf.mxu3 }
  0xa6   : > { %v577_v39 = vld [vmem:[#allocation3] sm:$0xff] }
  0xa7   : > { %527 = vmax.xlane.f32.xlu0 %v526_v38 }
 0x10c   : > { %v519_v43 = vpop.xlane.xlu1 %518 }
 0x10d   : > { %v1157_v44 = vmax.f32 %v1154_v42, %v519_v43 }
 0x10f   : > { %v533_v45 = vsub.f32 %v1154_v42, %v1157_v44  ;;  %723 = vst.msk [vmem:[#allocation2] sm:$0xff] %vm394_vm1, %v1157_v44  ;;  %547 = vperm.xlu0 %999, %v1157_v44  }
 0x112   : > { %v525_v47 = vpop.xlane.xlu0 %524 }
 0x113   : > { %v1169_v49 = vmax.f32 %v1164_v46, %v525_v47 }
 0x114   : > { %v522_v50 = vpop.xlane.xlu1 %521 }
 0x115   : > { %v535_v51 = vsub.f32 %v1164_v46, %v1169_v49  ;;  %725 = vst.msk [vmem:[#allocation2 + $0x10] sm:$0xff] %vm394_vm1, %v1169_v49  ;;  %v530_v52 = vmax.f32 %v1166_v48, %v522_v50  ;;  %557 = vperm.xlu2 %998, %v1169_v49   ;;  %v687_v46 = vld [vmem:[#allocation4] sm:$0xff] }
 0x117   : > { %v534_v53 = vsub.f32 %v1166_v48, %v530_v52  ;;  %724 = vst.msk [vmem:[#allocation2 + $0x8] sm:$0xff] %vm394_vm1, %v530_v52  ;;  %552 = vperm.xlu1 %1000, %v530_v52   ;;  %v541_v26 = vmul.f32 1.442695, %v535_v51 }
 0x119   : > { %v539_v27 = vmul.f32 1.442695, %v534_v53 }
 0x11a   : > { %v528_v55 = vpop.xlane.xlu0 %527 }
 0x11b   : > { %v1182_v56 = vmax.f32 %v1179_v54, %v528_v55 }
 0x11d   : > { %v536_v57 = vsub.f32 %v1179_v54, %v1182_v56  ;;  %726 = vst.msk [vmem:[#allocation2 + $0x18] sm:$0xff] %vm394_vm1, %v1182_v56  ;;  %562 = vperm.xlu2 %998, %v1182_v56  }
 0x11f   : > { %v543_v32 = vmul.f32 1.442695, %v536_v57  ;;  %v689_v57 = vld [vmem:[#allocation4 + $0x10] sm:$0xff] }
 0x16f   : > { %v558_v0 = vpop.permute.xlu2 %557 }
 0x170   : > { %v567_v2 = vsub.f32 %v1136_v30, %v558_v0 }
 0x172   : > { %v573_v4 = vmul.f32 1.442695, %v567_v2 }
 0x174   : > { %1002 = vpow2.f32 %v573_v4  ;;  %v688_v4 = vld [vmem:[#allocation4 + $0x8] sm:$0xff] }
 0x177   : > { %v563_v5 = vpop.permute.xlu2 %562 }
 0x178   : > { %v568_v6 = vsub.f32 %v1142_v36, %v563_v5 }
 0x17a   : > { %v1003_v7 = vpop.eup %1002  ;;  %v575_v8 = vmul.f32 1.442695, %v568_v6 }
 0x17b   : > { %v591_v9 = vsel %vm403_vm0, %v1003_v7, 0.0  ;;  %v608_v10 = vpack.c.bf16 %v1003_v7, %v1003_v7 }
 0x17c   : > { %1004 = vpow2.f32 %v575_v8  ;;  %592 = vadd.xlane.f32.xlu0 %v591_v9  ;;  %v580_v8 = vld [vmem:[#allocation3 + $0x18] sm:$0xff] }
 0x17d   : > { %954 = vmatmul.msk.bf16.vlgmr.msrb.gmra.mxu2 %vm403_vm0, %v608_v10 }
 0x181   : > { %v548_v11 = vpop.permute.xlu0 %547 }
 0x182   : > { %v1005_v12 = vpop.eup %1004  ;;  %v565_v13 = vsub.f32 %v1130_v25, %v548_v11  ;;  %v537_v25 = vmul.f32 1.442695, %v533_v45  ;;  %v578_v45 = vld [vmem:[#allocation3 + $0x8] sm:$0xff] }
 0x183   : > { %v609_v14 = vpack.c.bf16 %v1005_v12, %v1005_v12  ;;  %v594_v31 = vsel %vm403_vm0, %v1005_v12, 0.0  ;;  %v690_v12 = vld [vmem:[#allocation4 + $0x18] sm:$0xff] }
 0x184   : > { %v569_v15 = vmul.f32 1.442695, %v565_v13 }
 0x185   : > { %955 = vmatmul.msk.bf16.vlgmr.msrb.gmra.mxu3 %vm403_vm0, %v609_v14 }
 0x186   : > { %1006 = vpow2.f32 %v569_v15 }
 0x189   : > { %v553_v16 = vpop.permute.xlu1 %552 }
 0x18a   : > { %v566_v17 = vsub.f32 %v1134_v28, %v553_v16 }
 0x18c   : > { %v1007_v18 = vpop.eup %1006  ;;  %v571_v19 = vmul.f32 1.442695, %v566_v17 }
 0x18d   : > { %v585_v20 = vsel %vm403_vm0, %v1007_v18, 0.0  ;;  %v606_v21 = vpack.c.bf16 %v1007_v18, %v1007_v18 }
 0x18e   : > { %1008 = vpow2.f32 %v571_v19  ;;  %586 = vadd.xlane.f32.xlu2 %v585_v20 }
 0x18f   : > { %952 = vmatmul.msk.bf16.vlgmr.msrb.gmra.mxu0 %vm403_vm0, %v606_v21  ;;  %1010 = vpow2.f32 %v537_v25 }
 0x190   : > { %1012 = vpow2.f32 %v541_v26 }
 0x191   : > { %1014 = vpow2.f32 %v539_v27 }
 0x192   : > { %1016 = vpow2.f32 %v543_v32 }
 0x194   : > { %v1009_v22 = vpop.eup %1008 }
 0x195   : > { %v588_v23 = vsel %vm403_vm0, %v1009_v22, 0.0  ;;  %v607_v24 = vpack.c.bf16 %v1009_v22, %v1009_v22  ;;  %v1011_v28 = vpop.eup %1010 }
 0x196   : > { %589 = vadd.xlane.f32.xlu1 %v588_v23  ;;  %v1013_v29 = vpop.eup %1012  ;;  %v581_v42 = vmul.f32 %v1011_v28, %v577_v39 }
 0x197   : > { %953 = vmatmul.msk.bf16.vlgmr.msrb.gmra.mxu1 %vm403_vm0, %v607_v24  ;;  %v1015_v30 = vpop.eup %1014  ;;  %v583_v35 = vmul.f32 %v1013_v29, %v579_v33 }
 0x198   : > { %v1017_v34 = vpop.eup %1016  ;;  %v582_v49 = vmul.f32 %v1015_v30, %v578_v45 }
 0x199   : > { %v584_v9 = vmul.f32 %v1017_v34, %v580_v8 }
 0x1a6   : > { %693 = vperm.xlu2 %998, %v1011_v28  }
 0x1ae   : > { %703 = vperm.xlu2 %998, %v1013_v29  }
 0x1af   : > { %698 = vperm.xlu1 %1000, %v1015_v30  }
 0x1d7   : > { %595 = vadd.xlane.f32.xlu2 %v594_v31 }
 0x1ef   : > { %v593_v36 = vpop.xlane.xlu0 %592  ;;  %708 = vperm.xlu2 %998, %v1017_v34  }
 0x1f0   : > { %v599_v37 = vadd.f32 %v593_v36, %v583_v35 }
 0x1f2   : > { %604 = vst.msk [vmem:[#allocation3 + $0x10] sm:$0xff] %vm394_vm1, %v599_v37 }
 0x1f9   : > { %v732_v38 = vld [vmem:[#allocation3 + $0x10] sm:$0xff] }
 0x1fa   : > { %1018 = vrcp.f32 %v732_v38 }
 0x200   : > { %v1019_v40 = vpop.eup %1018  ;;  %v664_v41 = vpop.f32.mrf.mxu2 }
 0x201   : > { %v587_v43 = vpop.xlane.xlu2 %586  ;;  %754 = vperm.xlu1 %1000, %v1019_v40  }
 0x202   : > { %v597_v44 = vadd.f32 %v587_v43, %v581_v42 }
 0x204   : > { %602 = vst.msk [vmem:[#allocation3] sm:$0xff] %vm394_vm1, %v597_v44 }
 0x208   : > { %v666_v47 = vpop.f32.mrf.mxu2  ;;  %v683_v48 = vpop.f32.mrf.mxu3 }
 0x209   : > { %v694_v50 = vpop.permute.xlu2 %693  ;;  %v590_v51 = vpop.xlane.xlu1 %589 }
 0x20a   : > { %v711_v52 = vmul.f32 %v694_v50, %v687_v46  ;;  %v598_v53 = vadd.f32 %v590_v51, %v582_v49 }
 0x20b   : > { %v730_v54 = vld [vmem:[#allocation3] sm:$0xff] }
 0x20c   : > { %603 = vst.msk [vmem:[#allocation3 + $0x8] sm:$0xff] %vm394_vm1, %v598_v53  ;;  %v626_v55 = vpop.f32.mrf.mxu0  ;;  %1020 = vrcp.f32 %v730_v54 }
 0x20d   : > { %v715_v56 = vadd.f32 %v711_v52, %v626_v55 }
 0x20f   : > { %719 = vst.msk [vmem:[#allocation4] sm:$0xff] %vm403_vm0, %v715_v56 }
 0x210   : > { %v685_v58 = vpop.f32.mrf.mxu3 }
 0x211   : > { %v704_v59 = vpop.permute.xlu2 %703 }
 0x212   : > { %v1021_v60 = vpop.eup %1020  ;;  %v713_v61 = vmul.f32 %v704_v59, %v689_v57 }
 0x213   : > { %744 = vperm.xlu0 %999, %v1021_v60   ;;  %v731_v62 = vld [vmem:[#allocation3 + $0x8] sm:$0xff] }
 0x214   : > { %v717_v63 = vadd.f32 %v713_v61, %v664_v41  ;;  %v628_v0 = vpop.f32.mrf.mxu0  ;;  %v645_v1 = vpop.f32.mrf.mxu1  ;;  %1022 = vrcp.f32 %v731_v62 }
 0x216   : > { %721 = vst.msk [vmem:[#allocation4 + $0x10] sm:$0xff] %vm403_vm0, %v717_v63  ;;  %v738_v26 = vld [vmem:[#allocation4] sm:$0xff] }
 0x21a   : > { %v1023_v2 = vpop.eup %1022 }
 0x21b   : > { %749 = vperm.xlu2 %998, %v1023_v2  }
 0x21c   : > { %v647_v3 = vpop.f32.mrf.mxu1 }
 0x21d   : > { %v740_v18 = vld [vmem:[#allocation4 + $0x10] sm:$0xff] }
 0x221   : > { %v699_v5 = vpop.permute.xlu1 %698 }
 0x222   : > { %v712_v6 = vmul.f32 %v699_v5, %v688_v4 }
 0x224   : > { %v716_v7 = vadd.f32 %v712_v6, %v645_v1 }
 0x226   : > { %720 = vst.msk [vmem:[#allocation4 + $0x8] sm:$0xff] %vm403_vm0, %v716_v7 }
 0x22d   : > { %v739_v21 = vld [vmem:[#allocation4 + $0x8] sm:$0xff] }
 0x24a   : > { %v596_v10 = vpop.xlane.xlu2 %595 }
 0x24b   : > { %v600_v11 = vadd.f32 %v596_v10, %v584_v9 }
 0x24d   : > { %605 = vst.msk [vmem:[#allocation3 + $0x18] sm:$0xff] %vm394_vm1, %v600_v11 }
 0x252   : > { %v709_v13 = vpop.permute.xlu2 %708 }
 0x253   : > { %v714_v14 = vmul.f32 %v709_v13, %v690_v12 }
 0x254   : > { %v733_v15 = vld [vmem:[#allocation3 + $0x18] sm:$0xff] }
 0x255   : > { %v718_v16 = vadd.f32 %v714_v14, %v683_v48  ;;  %1024 = vrcp.f32 %v733_v15 }
 0x257   : > { %722 = vst.msk [vmem:[#allocation4 + $0x18] sm:$0xff] %vm403_vm0, %v718_v16 }
 0x25b   : > { %v1025_v17 = vpop.eup %1024 }
 0x25c   : > { %759 = vperm.xlu2 %998, %v1025_v17  }
 0x25e   : > { %v741_v30 = vld [vmem:[#allocation4 + $0x18] sm:$0xff] }
 0x273   : > { %v755_v19 = vpop.permute.xlu1 %754 }
 0x274   : > { %v764_v20 = vmul.f32 %v755_v19, %v740_v18 }
 0x275   : > { %v750_v22 = vpop.permute.xlu2 %749 }
 0x276   : > { %v768_v23 = vpack.c.bf16 %v764_v20, %v764_v20  ;;  %v763_v24 = vmul.f32 %v750_v22, %v739_v21 }
 0x278   : > { %773 = vst.msk [vmem:[%s387_s10 + $0x8] sm:$0xf] %vm770_vm3, %v768_v23  ;;  %v767_v25 = vpack.c.bf16 %v763_v24, %v763_v24 }
 0x27a   : > { %772 = vst.msk [vmem:[%s387_s10 + $0x4] sm:$0xf] %vm770_vm3, %v767_v25 }
 0x285   : > { %v745_v27 = vpop.permute.xlu0 %744 }
 0x286   : > { %v762_v28 = vmul.f32 %v745_v27, %v738_v26 }
 0x288   : > { %v766_v29 = vpack.c.bf16 %v762_v28, %v762_v28 }
 0x28a   : > { %771 = vst.msk [vmem:[%s387_s10] sm:$0xf] %vm770_vm3, %v766_v29 }
 0x2b6   : > { %v760_v31 = vpop.permute.xlu2 %759 }
 0x2b7   : > { %v765_v32 = vmul.f32 %v760_v31, %v741_v30 }
 0x2b9   : > { %v769_v33 = vpack.c.bf16 %v765_v32, %v765_v32 }
 0x2bb   : > { %774 = vst.msk [vmem:[%s387_s10 + $0xc] sm:$0xf] %vm770_vm3, %v769_v33 }
 0x2bc PF: > { %s14_s17 = sadd.s32 1, %s1048_s17   ;;  %s1241_s15 = smov %s1044_s16 }
 0x2bd   : > { %p11_p5 = scmp.ge.s32.totalorder %s14_s17, 4   ;;  %s1242_s16 = smov %s1244_s18 }
 0x2bf   :  { %13 = sbr.rel (!%p11_p5) target bundleno = 2 (0x2), region = 83 }

// kernel: bert_encoder_forward.13
= control target key start
LH: loop header
LB: loop body
LE: loop exit
PB: predicated region body
PF: predicated region fallthrough
CT: control target
= control target key end

     0   :  { %vm42_vm0 = vcmask 261120   ;;  %vm150_vm8 = vcmask 519168   ;;  %s231_s1 = inlined_call_operand.vmem [shape: bf16[32,64], index: 1, kind: input, shape index: {}]   ;;  %s232_s2 = inlined_call_operand.vmem [shape: f32[1,64], index: 2, kind: input, shape index: {}]   ;;  %s233_s0 = inlined_call_operand.vmem [shape: bf16[16,32], index: 0, kind: input, shape index: {}]   ;;  %s234_s3 = inlined_call_operand.vmem [shape: bf16[16,64], index: 3, kind: output, shape index: {}]  }
   0x1   :  { %v174_v0 = vld [vmem:[%s231_s1 + $0x8] sm:$0xff]  ;;  %v173_v1 = vld [vmem:[%s231_s1] sm:$0xff] }
   0x2   :  { %52 = vmatpush.bf16.msra.mxu0 %v174_v0  ;;  %v172_v2 = vld [vmem:[%s233_s0] sm:$0xff] }
   0x3   :  { %v175_v3 = vld [vmem:[%s232_s2] ss:$0 sm:$0xff] }
   0x6   :  { %53 = vmatpush.bf16.msra.mxu0 %v173_v1 }
   0x9   :  { %169 = vmatmul.msk.bf16.vlgmr.msra.gmra.mxu0 %vm42_vm0, %v172_v2 }
  0x86   :  { %v55_v4 = vpop.f32.mrf.mxu0 }
  0x87   :  { %v212_v5 = vadd.f32 %v175_v3, %v55_v4 }
  0x89   :  { %v62_v6 = vmul.f32 0.70710677, %v212_v5 }
  0x8b   :  { %v64_v7 = vmul.f32 %v62_v6, %v62_v6 }
  0x8d   :  { %v65_v8 = vmin.f32 %v64_v7, 16.0 }
  0x8e   :  { %v57_v9 = vpop.f32.mrf.mxu0 }
  0x8f   :  { %v66_v10 = vmul.f32 2.1237322e-06, %v65_v8  ;;  %v77_v11 = vmul.f32 3.8918573e-05, %v65_v8  ;;  %v215_v12 = vadd.f32 %v175_v3, %v57_v9 }
  0x91   :  { %v67_v13 = vadd.f32 0.00028619796, %v66_v10  ;;  %v78_v14 = vadd.f32 0.001143296, %v77_v11  ;;  %v218_v15 = vmul.f32 0.70710677, %v215_v12 }
  0x92   :  { %v60_v11 = vmul.f32 0.5, %v212_v5  ;;  %v61_v5 = vmul.f32 0.5, %v215_v12 }
  0x93   :  { %v68_v16 = vmul.f32 %v67_v13, %v65_v8  ;;  %v79_v17 = vmul.f32 %v78_v14, %v65_v8  ;;  %v104_v18 = vmul.f32 %v218_v15, %v218_v15 }
  0x95   :  { %v80_v19 = vadd.f32 0.014752088, %v79_v17  ;;  %v69_v20 = vadd.f32 0.0036580483, %v68_v16  ;;  %v105_v21 = vmin.f32 %v104_v18, 16.0 }
  0x97   :  { %v81_v22 = vmul.f32 %v80_v19, %v65_v8  ;;  %v106_v23 = vmul.f32 2.1237322e-06, %v105_v21  ;;  %v117_v24 = vmul.f32 3.8918573e-05, %v105_v21  ;;  %v70_v26 = vmul.f32 %v69_v20, %v65_v8 }
  0x99   :  { %v82_v25 = vadd.f32 0.112945676, %v81_v22  ;;  %v107_v27 = vadd.f32 0.00028619796, %v106_v23  ;;  %v118_v28 = vadd.f32 0.001143296, %v117_v24 }
  0x9a   :  { %v71_v33 = vadd.f32 0.05243302, %v70_v26 }
  0x9b   :  { %v83_v29 = vmul.f32 %v82_v25, %v65_v8  ;;  %v108_v30 = vmul.f32 %v107_v27, %v105_v21  ;;  %v119_v31 = vmul.f32 %v118_v28, %v105_v21 }
  0x9c   :  { %v72_v39 = vmul.f32 %v71_v33, %v65_v8 }
  0x9d   :  { %v84_v32 = vadd.f32 0.4994258, %v83_v29  ;;  %v120_v34 = vadd.f32 0.014752088, %v119_v31  ;;  %v109_v36 = vadd.f32 0.0036580483, %v108_v30 }
  0x9e   :  { %v73_v43 = vadd.f32 0.18741608, %v72_v39 }
  0x9f   :  { %v85_v35 = vmul.f32 %v84_v32, %v65_v8  ;;  %v121_v37 = vmul.f32 %v120_v34, %v105_v21  ;;  %v110_v41 = vmul.f32 %v109_v36, %v105_v21 }
  0xa0   :  { %v74_v48 = vmul.f32 %v73_v43, %v65_v8 }
  0xa1   :  { %v86_v38 = vadd.f32 1.0, %v85_v35  ;;  %v122_v40 = vadd.f32 0.112945676, %v121_v37  ;;  %v111_v45 = vadd.f32 0.05243302, %v110_v41 }
  0xa2   :  { %v75_v54 = vadd.f32 1.1283791, %v74_v48 }
  0xa3   :  { %176 = vrcp.f32 %v86_v38  ;;  %v123_v42 = vmul.f32 %v122_v40, %v105_v21  ;;  %v112_v51 = vmul.f32 %v111_v45, %v105_v21  ;;  %v98_v53 = vand.u32 2147483648, %v86_v38 }
  0xa4   :  { %v96_v56 = vand.u32 2147483647, %v86_v38  ;;  %vm92_vm2 = vweird.f32 %v86_v38  ;;  %v76_v61 = vmul.f32 %v75_v54, %v62_v6 }
  0xa5   :  { %v124_v44 = vadd.f32 0.4994258, %v123_v42  ;;  %v113_v57 = vadd.f32 0.18741608, %v112_v51  ;;  %v99_v59 = vor.u32 1.1754944e-38, %v98_v53 }
  0xa6   :  { %vm97_vm4 = vcmp.eq.f32.partialorder %v96_v56, 8.507059e+37 }
  0xa7   :  { %v125_v46 = vmul.f32 %v124_v44, %v105_v21  ;;  %v114_v0 = vmul.f32 %v113_v57, %v105_v21 }
  0xa9   :  { %v177_v47 = vpop.eup %176  ;;  %v126_v50 = vadd.f32 1.0, %v125_v46  ;;  %v115_v8 = vadd.f32 1.1283791, %v114_v0 }
  0xaa   :  { %v88_v49 = vmul.f32 %v177_v47, %v86_v38  ;;  %vm93_vm1 = vweird.f32 %v177_v47 }
  0xab   :  { %178 = vrcp.f32 %v126_v50  ;;  %vm94_vm3 = vmor %vm92_vm2, %vm93_vm1  ;;  %v138_v7 = vand.u32 2147483648, %v126_v50  ;;  %v136_v10 = vand.u32 2147483647, %v126_v50  ;;  %vm132_vm6 = vweird.f32 %v126_v50 }
  0xac   :  { %v89_v52 = vsub.f32 1.0, %v88_v49  ;;  %v116_v17 = vmul.f32 %v115_v8, %v218_v15 }
  0xad   :  { %v139_v6 = vor.u32 1.1754944e-38, %v138_v7  ;;  %vm137_vm9 = vcmp.eq.f32.partialorder %v136_v10, 8.507059e+37 }
  0xae   :  { %v90_v55 = vmul.f32 %v177_v47, %v89_v52 }
  0xb0   :  { %v91_v58 = vadd.f32 %v177_v47, %v90_v55 }
  0xb1   :  { %v179_v60 = vpop.eup %178 }
  0xb2   :  { %v95_v62 = vsel %vm94_vm3, %v177_v47, %v91_v58  ;;  %v128_v1 = vmul.f32 %v179_v60, %v126_v50  ;;  %vm133_vm5 = vweird.f32 %v179_v60 }
  0xb3   :  { %v100_v63 = vsel %vm97_vm4, %v99_v59, %v95_v62  ;;  %vm134_vm7 = vmor %vm132_vm6, %vm133_vm5 }
  0xb4   :  { %v101_v2 = vmul.f32 %v100_v63, %v76_v61  ;;  %v129_v3 = vsub.f32 1.0, %v128_v1 }
  0xb6   :  { %v170_v4 = vclamps-f32 %v101_v2, 1.0  ;;  %v130_v9 = vmul.f32 %v179_v60, %v129_v3 }
  0xb8   :  { %v144_v13 = vadd.f32 1.0, %v170_v4  ;;  %v131_v14 = vadd.f32 %v179_v60, %v130_v9 }
  0xba   :  { %v146_v16 = vmul.f32 %v144_v13, %v60_v11  ;;  %v135_v18 = vsel %vm134_vm7, %v179_v60, %v131_v14 }
  0xbb   :  { %v140_v20 = vsel %vm137_vm9, %v139_v6, %v135_v18 }
  0xbc   :  { %v148_v19 = vpack.c.bf16 %v146_v16, %v146_v16  ;;  %v141_v21 = vmul.f32 %v140_v20, %v116_v17 }
  0xbe   :  { %151 = vst.msk [vmem:[%s234_s3] sm:$0xf] %vm150_vm8, %v148_v19  ;;  %v171_v22 = vclamps-f32 %v141_v21, 1.0 }
  0xc0   :  { %v145_v23 = vadd.f32 1.0, %v171_v22 }
  0xc2   :  { %v147_v24 = vmul.f32 %v145_v23, %v61_v5 }
  0xc4   :  { %v149_v25 = vpack.c.bf16 %v147_v24, %v147_v24 }
  0xc6   :  { %152 = vst.msk [vmem:[%s234_s3 + $0x4] sm:$0xf] %vm150_vm8, %v149_v25 }

// kernel: bert_encoder_forward.14
= control target key start
LH: loop header
LB: loop body
LE: loop exit
PB: predicated region body
PF: predicated region fallthrough
CT: control target
= control target key end

     0   :  { %vm67_vm0 = vcmask 523264   ;;  %vm89_vm1 = vcmask 261120   ;;  %v195_v16 = vmov 32.0   ;;  %s273_s1 = inlined_call_operand.vmem [shape: bf16[64,32], index: 1, kind: input, shape index: {}]   ;;  %s274_s2 = inlined_call_operand.vmem [shape: f32[1,32], index: 2, kind: input, shape index: {}]   ;;  %s275_s0 = inlined_call_operand.vmem [shape: bf16[16,64], index: 0, kind: input, shape index: {}]   ;;  %s276_s3 = inlined_call_operand.vmem [shape: f32[16,32], index: 3, kind: input, shape index: {}]   ;;  %s277_s4 = inlined_call_operand.vmem [shape: f32[1,32], index: 4, kind: input, shape index: {}]   ;;  %s278_s5 = inlined_call_operand.vmem [shape: f32[1,32], index: 5, kind: input, shape index: {}]   ;;  %s279_s6 = inlined_call_operand.vmem [shape: f32[16,32], index: 6, kind: output, shape index: {}]  }
   0x1   :  { %v184_v0 = vld [vmem:[%s273_s1 + $0x18] sm:$0xff]  ;;  %v183_v1 = vld [vmem:[%s273_s1 + $0x10] sm:$0xff]  ;;  %v182_v2 = vld [vmem:[%s273_s1 + $0x8] sm:$0xff]  ;;  %189 = vrcp.f32 %v195_v16 }
   0x2   :  { %75 = vmatpush.bf16.msra.mxu0 %v184_v0  ;;  %v181_v3 = vld [vmem:[%s273_s1] sm:$0xff]  ;;  %v86_v12 = vld [vmem:[%s276_s3 + $0x8] sm:$0xff] }
   0x3   :  { %v180_v4 = vld [vmem:[%s275_s0] sm:$0xff] }
   0x4   :  { %v186_v5 = vld [vmem:[%s274_s2] ss:$0 sm:$0xff] }
   0x5   :  { %v85_v7 = vld [vmem:[%s276_s3] sm:$0xff] }
   0x6   :  { %76 = vmatpush.bf16.msra.mxu0 %v183_v1  ;;  %v187_v47 = vld [vmem:[%s277_s4] ss:$0 sm:$0xff] }
   0x7   :  { %v190_v17 = vpop.eup %189  ;;  %v188_v50 = vld [vmem:[%s278_s5] ss:$0 sm:$0xff] }
   0x8   :  { %v97_v18 = vmul.f32 32.0, %v190_v17  ;;  %vm101_vm2 = vweird.f32 %v190_v17 }
   0xa   :  { %77 = vmatpush.bf16.msra.mxu0 %v182_v2  ;;  %v98_v19 = vsub.f32 1.0, %v97_v18 }
   0xc   :  { %v99_v20 = vmul.f32 %v190_v17, %v98_v19 }
   0xe   :  { %78 = vmatpush.bf16.msra.mxu0 %v181_v3  ;;  %v100_v21 = vadd.f32 %v190_v17, %v99_v20 }
  0x10   :  { %v102_v22 = vsel %vm101_vm2, %v190_v17, %v100_v21 }
  0x11   :  { %179 = vmatmul.msk.bf16.vlgmr.msra.gmra.mxu0 %vm67_vm0, %v180_v4 }
  0x8e   :  { %v80_v6 = vpop.f32.mrf.mxu0 }
  0x8f   :  { %v81_v8 = vadd.f32 %v186_v5, %v80_v6 }
  0x91   :  { %v87_v9 = vadd.f32 %v85_v7, %v81_v8 }
  0x93   :  { %v90_v10 = vsel %vm89_vm1, %v87_v9, 0.0 }
  0x94   :  { %91 = vadd.xlane.f32.xlu0 %v90_v10 }
  0x96   :  { %v82_v11 = vpop.f32.mrf.mxu0 }
  0x97   :  { %v83_v13 = vadd.f32 %v186_v5, %v82_v11 }
  0x99   :  { %v88_v14 = vadd.f32 %v86_v12, %v83_v13 }
  0x9b   :  { %v93_v15 = vsel %vm89_vm1, %v88_v14, 0.0 }
  0x9c   :  { %94 = vadd.xlane.f32.xlu0 %v93_v15 }
 0x107   :  { %v92_v23 = vpop.xlane.xlu0 %91 }
 0x108   :  { %v103_v24 = vmul.f32 %v102_v22, %v92_v23 }
 0x10a   :  { %v105_v25 = vsub.f32 %v87_v9, %v103_v24 }
 0x10c   :  { %v107_v26 = vmul.f32 %v105_v25, %v105_v25 }
 0x10e   :  { %v109_v27 = vsel %vm89_vm1, %v107_v26, 0.0 }
 0x10f   :  { %110 = vadd.xlane.f32.xlu1 %v109_v27  ;;  %v95_v28 = vpop.xlane.xlu0 %94 }
 0x110   :  { %v104_v29 = vmul.f32 %v102_v22, %v95_v28 }
 0x112   :  { %v106_v30 = vsub.f32 %v88_v14, %v104_v29 }
 0x114   :  { %v108_v31 = vmul.f32 %v106_v30, %v106_v30 }
 0x116   :  { %v112_v32 = vsel %vm89_vm1, %v108_v31, 0.0 }
 0x117   :  { %113 = vadd.xlane.f32.xlu1 %v112_v32 }
 0x182   :  { %v111_v33 = vpop.xlane.xlu1 %110 }
 0x183   :  { %v115_v34 = vmul.f32 %v111_v33, %v102_v22 }
 0x185   :  { %v117_v35 = vadd.f32 1e-12, %v115_v34 }
 0x187   :  { %191 = vrsqrt.f32 %v117_v35  ;;  %vm125_vm4 = vweird.f32 %v117_v35 }
 0x18a   :  { %v114_v36 = vpop.xlane.xlu1 %113 }
 0x18b   :  { %v116_v37 = vmul.f32 %v114_v36, %v102_v22 }
 0x18d   :  { %v192_v38 = vpop.eup %191  ;;  %v118_v39 = vadd.f32 1e-12, %v116_v37 }
 0x18e   :  { %v120_v40 = vmul.f32 %v192_v38, %v117_v35  ;;  %vm126_vm3 = vweird.f32 %v192_v38 }
 0x18f   :  { %193 = vrsqrt.f32 %v118_v39  ;;  %vm127_vm5 = vmor %vm125_vm4, %vm126_vm3  ;;  %vm135_vm7 = vweird.f32 %v118_v39 }
 0x190   :  { %v121_v41 = vmul.f32 %v192_v38, %v120_v40 }
 0x192   :  { %v122_v42 = vmul.f32 0.5, %v121_v41 }
 0x194   :  { %v123_v43 = vsub.f32 1.5, %v122_v42 }
 0x195   :  { %v194_v44 = vpop.eup %193 }
 0x196   :  { %v124_v45 = vmul.f32 %v192_v38, %v123_v43  ;;  %v130_v46 = vmul.f32 %v194_v44, %v118_v39  ;;  %vm136_vm6 = vweird.f32 %v194_v44 }
 0x197   :  { %vm137_vm8 = vmor %vm135_vm7, %vm136_vm6 }
 0x198   :  { %v128_v48 = vsel %vm127_vm5, %v192_v38, %v124_v45  ;;  %v131_v49 = vmul.f32 %v194_v44, %v130_v46 }
 0x199   :  { %v139_v51 = vmul.f32 %v128_v48, %v105_v25 }
 0x19a   :  { %v132_v52 = vmul.f32 0.5, %v131_v49 }
 0x19b   :  { %v145_v53 = vmul.f32 %v187_v47, %v139_v51 }
 0x19c   :  { %v133_v54 = vsub.f32 1.5, %v132_v52 }
 0x19d   :  { %v151_v55 = vadd.f32 %v188_v50, %v145_v53 }
 0x19e   :  { %v134_v56 = vmul.f32 %v194_v44, %v133_v54 }
 0x19f   :  { %153 = vst.msk [vmem:[%s279_s6] sm:$0xff] %vm89_vm1, %v151_v55 }
 0x1a0   :  { %v138_v57 = vsel %vm137_vm8, %v194_v44, %v134_v56 }
 0x1a1   :  { %v140_v58 = vmul.f32 %v138_v57, %v106_v30 }
 0x1a3   :  { %v146_v59 = vmul.f32 %v187_v47, %v140_v58 }
 0x1a5   :  { %v152_v60 = vadd.f32 %v188_v50, %v146_v59 }
 0x1a7   :  { %154 = vst.msk [vmem:[%s279_s6 + $0x8] sm:$0xff] %vm89_vm1, %v152_v60 }

// kernel: bert_encoder_forward.19
= control target key start
LH: loop header
LB: loop body
LE: loop exit
PB: predicated region body
PF: predicated region fallthrough
CT: control target
= control target key end

     0   :  { %s317_s0 = inlined_call_operand.vmem [shape: bf16[16,64], index: 0, kind: input, shape index: {}]   ;;  %s318_s1 = inlined_call_operand.vmem [shape: bf16[64,32], index: 1, kind: input, shape index: {}]   ;;  %s319_s2 = inlined_call_operand.vmem [shape: f32[1,32], index: 2, kind: input, shape index: {}]   ;;  %s320_s3 = inlined_call_operand.vmem [shape: f32[16,32], index: 3, kind: input, shape index: {}]   ;;  %s321_s4 = inlined_call_operand.vmem [shape: f32[1,32], index: 4, kind: input, shape index: {}]   ;;  %s322_s5 = inlined_call_operand.vmem [shape: f32[1,32], index: 5, kind: input, shape index: {}]   ;;  %s323_s6 = inlined_call_operand.hbm [shape: f32[16,32], index: 6, kind: output, shape index: {}]  }
   0x1   :  { %v199_v0 = vld [vmem:[%s318_s1 + $0x18] sm:$0xff]  ;;  %v198_v1 = vld [vmem:[%s318_s1 + $0x10] sm:$0xff] }
   0x2   :  { %76 = vmatpush.bf16.msra.mxu0 %v199_v0 }
   0x3   :  { %11 = vsyncpa [#allocation3], 0  ;;  %v197_v2 = vld [vmem:[%s318_s1 + $0x8] sm:$0xff]  ;;  %v196_v3 = vld [vmem:[%s318_s1] sm:$0xff]  ;;  %vm68_vm0 = vcmask 523264   ;;  %vm90_vm1 = vcmask 261120  }
   0x4   :  { %v195_v4 = vld [vmem:[%s317_s0] sm:$0xff]  ;;  %v87_v12 = vld [vmem:[%s320_s3 + $0x8] sm:$0xff]  ;;  %v239_v16 = vmov 32.0   ;;  %s162_s16 = sshll.u32 %s323_s6, 4  ;;  %s242_s17 = smov 8   ;;  %s163_s16 = int_to_ptr.hbm [resolvable:$true] %s162_s16 }
   0x5   :  { %v204_v5 = vld [vmem:[%s319_s2] ss:$0 sm:$0xff]  ;;  %207 = vrcp.f32 %v239_v16 }
   0x6   :  { %77 = vmatpush.bf16.msra.mxu0 %v198_v1  ;;  %v86_v7 = vld [vmem:[%s320_s3] sm:$0xff] }
   0x7   :  { %v205_v47 = vld [vmem:[%s321_s4] ss:$0 sm:$0xff]  ;;  %s240_s4 = smov [#allocation2]  }
   0x8   :  { %v206_v51 = vld [vmem:[%s322_s5] ss:$0 sm:$0xff]  ;;  %s160_s13 = sshll.u32 %s240_s4, 4  ;;  %s241_s5 = smov 128   ;;  %s161_s13 = int_to_ptr.vmem [resolvable:$true] %s160_s13 }
   0xa   :  { %78 = vmatpush.bf16.msra.mxu0 %v197_v2 }
   0xb   :  { %v208_v17 = vpop.eup %207 }
   0xc   :  { %v98_v18 = vmul.f32 32.0, %v208_v17  ;;  %vm102_vm2 = vweird.f32 %v208_v17 }
   0xe   :  { %79 = vmatpush.bf16.msra.mxu0 %v196_v3  ;;  %v99_v19 = vsub.f32 1.0, %v98_v18 }
  0x10   :  { %v100_v20 = vmul.f32 %v208_v17, %v99_v19 }
  0x11   :  { %194 = vmatmul.msk.bf16.vlgmr.msra.gmra.mxu0 %vm68_vm0, %v195_v4 }
  0x12   :  { %v101_v21 = vadd.f32 %v208_v17, %v100_v20 }
  0x14   :  { %v103_v22 = vsel %vm102_vm2, %v208_v17, %v101_v21 }
  0x8e   :  { %v81_v6 = vpop.f32.mrf.mxu0 }
  0x8f   :  { %v82_v8 = vadd.f32 %v204_v5, %v81_v6 }
  0x91   :  { %v88_v9 = vadd.f32 %v86_v7, %v82_v8 }
  0x93   :  { %v91_v10 = vsel %vm90_vm1, %v88_v9, 0.0 }
  0x94   :  { %92 = vadd.xlane.f32.xlu0 %v91_v10 }
  0x96   :  { %v83_v11 = vpop.f32.mrf.mxu0 }
  0x97   :  { %v84_v13 = vadd.f32 %v204_v5, %v83_v11 }
  0x99   :  { %v89_v14 = vadd.f32 %v87_v12, %v84_v13 }
  0x9b   :  { %v94_v15 = vsel %vm90_vm1, %v89_v14, 0.0 }
  0x9c   :  { %95 = vadd.xlane.f32.xlu0 %v94_v15 }
 0x107   :  { %v93_v23 = vpop.xlane.xlu0 %92 }
 0x108   :  { %v104_v24 = vmul.f32 %v103_v22, %v93_v23 }
 0x10a   :  { %v106_v25 = vsub.f32 %v88_v9, %v104_v24 }
 0x10c   :  { %v108_v26 = vmul.f32 %v106_v25, %v106_v25 }
 0x10e   :  { %v110_v27 = vsel %vm90_vm1, %v108_v26, 0.0 }
 0x10f   :  { %111 = vadd.xlane.f32.xlu1 %v110_v27  ;;  %v96_v28 = vpop.xlane.xlu0 %95 }
 0x110   :  { %v105_v29 = vmul.f32 %v103_v22, %v96_v28 }
 0x112   :  { %v107_v30 = vsub.f32 %v89_v14, %v105_v29 }
 0x114   :  { %v109_v31 = vmul.f32 %v107_v30, %v107_v30 }
 0x116   :  { %v113_v32 = vsel %vm90_vm1, %v109_v31, 0.0 }
 0x117   :  { %114 = vadd.xlane.f32.xlu1 %v113_v32 }
 0x182   :  { %v112_v33 = vpop.xlane.xlu1 %111 }
 0x183   :  { %v116_v34 = vmul.f32 %v112_v33, %v103_v22 }
 0x185   :  { %v118_v35 = vadd.f32 1e-12, %v116_v34 }
 0x187   :  { %209 = vrsqrt.f32 %v118_v35  ;;  %vm126_vm4 = vweird.f32 %v118_v35 }
 0x18a   :  { %v115_v36 = vpop.xlane.xlu1 %114 }
 0x18b   :  { %v117_v37 = vmul.f32 %v115_v36, %v103_v22 }
 0x18d   :  { %v210_v38 = vpop.eup %209  ;;  %v119_v39 = vadd.f32 1e-12, %v117_v37 }
 0x18e   :  { %v121_v40 = vmul.f32 %v210_v38, %v118_v35  ;;  %vm127_vm3 = vweird.f32 %v210_v38 }
 0x18f   :  { %211 = vrsqrt.f32 %v119_v39  ;;  %vm128_vm5 = vmor %vm126_vm4, %vm127_vm3  ;;  %vm136_vm7 = vweird.f32 %v119_v39 }
 0x190   :  { %v122_v41 = vmul.f32 %v210_v38, %v121_v40 }
 0x192   :  { %v123_v42 = vmul.f32 0.5, %v122_v41 }
 0x194   :  { %v124_v43 = vsub.f32 1.5, %v123_v42 }
 0x195   :  { %v212_v44 = vpop.eup %211 }
 0x196   :  { %v125_v45 = vmul.f32 %v210_v38, %v124_v43  ;;  %v131_v46 = vmul.f32 %v212_v44, %v119_v39  ;;  %vm137_vm6 = vweird.f32 %v212_v44 }
 0x197   :  { %vm138_vm8 = vmor %vm136_vm7, %vm137_vm6 }
 0x198   :  { %v129_v48 = vsel %vm128_vm5, %v210_v38, %v125_v45  ;;  %v132_v49 = vmul.f32 %v212_v44, %v131_v46 }
 0x199   :  { %v140_v50 = vmul.f32 %v129_v48, %v106_v25 }
 0x19a   :  { %v133_v52 = vmul.f32 0.5, %v132_v49 }
 0x19b   :  { %v146_v53 = vmul.f32 %v205_v47, %v140_v50 }
 0x19c   :  { %v134_v54 = vsub.f32 1.5, %v133_v52 }
 0x19d   :  { %v152_v55 = vadd.f32 %v206_v51, %v146_v53 }
 0x19e   :  { %v135_v56 = vmul.f32 %v212_v44, %v134_v54 }
 0x19f   :  { %154 = vst.msk [vmem:[#allocation2] sm:$0xff] %vm90_vm1, %v152_v55 }
 0x1a0   :  { %v139_v57 = vsel %vm138_vm8, %v212_v44, %v135_v56 }
 0x1a1   :  { %v141_v58 = vmul.f32 %v139_v57, %v107_v30 }
 0x1a3   :  { %v147_v59 = vmul.f32 %v205_v47, %v141_v58 }
 0x1a5   :  { %v153_v60 = vadd.f32 %v206_v51, %v147_v59 }
 0x1a7   :  { %155 = vst.msk [vmem:[#allocation2 + $0x8] sm:$0xff] %vm90_vm1, %v153_v60 }
 0x1a8   :  { %168 = dma.vmem_to_hbm [thread:$0]  %s161_s13, 256, %s163_s16, [#allocation3], %s241_s5, %s241_s5, %s242_s17  }
 0x1a9   :  { %237 = dma.done.wait [#allocation3], 256  }
 0x1aa   :  { %238 = vsyncadd [#allocation3], 4294967040 }
 0x1ab   :  { %173 = vsyncpa [#allocation3], 1 }

</bundles_post_ra>
